<compile_context>
chip_gen: v7x
topology: tpu7x:2x2x1
jax: 0.10.0
libtpu: 0.0.40
codegen_flags: <defaults>
</compile_context>

<pallas_src>
import functools

import jax
import jax.numpy as jnp
from jax.experimental import pallas as pl
from jax.experimental.pallas import tpu as pltpu

_VMEM_LIMIT_BYTES = 48 * 1024 * 1024
_ENC_TILE_N = 2048          # target points per encoder grid step
_FINE_TILE_TARGET = 1024    # target fine points per fine-decoder grid step


def _relu(x):
    return jnp.maximum(x, 0.0)


def _bcast_spec(a):
    """Whole-array BlockSpec (weights: resident, same block for every grid step)."""
    nd = a.ndim
    shape = tuple(a.shape)
    return pl.BlockSpec(shape, lambda *_: (0,) * nd)


def _pick_n_tile(n, target=_ENC_TILE_N):
    if n <= target:
        return n
    for tn in range(target, 0, -128):
        if n % tn == 0:
            return tn
    return n


def _pick_coarse_tile(num_coarse, r, target_fine=_FINE_TILE_TARGET):
    if num_coarse * r <= target_fine:
        return num_coarse
    upper = max(1, target_fine // r)
    for tc in range(min(num_coarse, upper), 0, -1):
        if num_coarse % tc == 0 and (tc * r) % 128 == 0:
            return tc
    return num_coarse


# --------------------------------------------------------------------------- #
# Kernel 1: fused encoder (point-wise MLP + max-pool over points, accumulated  #
# across point tiles) and coarse decoder (run once, on the last point tile).   #
# Grid = (B, num_point_tiles); batch axis parallel, point axis arbitrary.      #
# --------------------------------------------------------------------------- #
def _encoder_coarse_kernel(x_ref,
                           ew1, eb1, ew2, eb2, ew3, eb3, ew4, eb4,
                           dw1, db1, dw2, db2, dw3, db3,
                           fw1z,
                           coarse_ref, zfold_ref,
                           z_acc):
    n = pl.program_id(1)

    @pl.when(n == 0)
    def _init():
        z_acc[...] = jnp.full(z_acc.shape, -jnp.inf, dtype=jnp.float32)

    bf16 = jnp.bfloat16
    x = x_ref[...].astype(bf16)                                                  # (tn, 3)
    h = _relu(jnp.dot(x, ew1[...], preferred_element_type=jnp.float32) + eb1[...])
    h = _relu(jnp.dot(h.astype(bf16), ew2[...], preferred_element_type=jnp.float32) + eb2[...])
    h = _relu(jnp.dot(h.astype(bf16), ew3[...], preferred_element_type=jnp.float32) + eb3[...])
    h = jnp.dot(h.astype(bf16), ew4[...], preferred_element_type=jnp.float32) + eb4[...]   # (tn, L)
    z_acc[...] = jnp.maximum(z_acc[...], jnp.max(h, axis=0, keepdims=True))      # (1, L)

    @pl.when(n == pl.num_programs(1) - 1)
    def _finalize():
        z = z_acc[...]                                                           # (1, L) f32
        zb = z.astype(bf16)
        d = _relu(jnp.dot(zb, dw1[...], preferred_element_type=jnp.float32) + db1[...])
        d = _relu(jnp.dot(d.astype(bf16), dw2[...], preferred_element_type=jnp.float32) + db2[...])
        coarse_ref[...] = (jnp.dot(d.astype(bf16), dw3[...],
                                   preferred_element_type=jnp.float32) + db3[...])   # (1, 3*nc)
        # latent's contribution to the first folding layer (shared by all fine points)
        zfold_ref[...] = jnp.dot(zb, fw1z[...], preferred_element_type=jnp.float32)   # (1, fh)


def _encode_and_coarse(x_bn3, kp):
    B, N, _ = x_bn3.shape
    tn = _pick_n_tile(N)
    nt = N // tn
    nc3 = kp["dec_w3"].shape[1]
    fh = kp["fold_w1z"].shape[1]
    L = kp["enc_w4"].shape[1]
    weights = [kp[k] for k in ("enc_w1", "enc_b1", "enc_w2", "enc_b2",
                               "enc_w3", "enc_b3", "enc_w4", "enc_b4",
                               "dec_w1", "dec_b1", "dec_w2", "dec_b2",
                               "dec_w3", "dec_b3", "fold_w1z")]
    coarse_row, zfold_row = pl.pallas_call(
        _encoder_coarse_kernel,
        out_shape=(jax.ShapeDtypeStruct((B, 1, nc3), jnp.float32),
                   jax.ShapeDtypeStruct((B, 1, fh), jnp.float32)),
        grid=(B, nt),
        in_specs=[pl.BlockSpec((None, tn, 3), lambda b, n: (b, n, 0))]
        + [_bcast_spec(a) for a in weights],
        out_specs=(pl.BlockSpec((None, 1, nc3), lambda b, n: (b, 0, 0)),
                   pl.BlockSpec((None, 1, fh), lambda b, n: (b, 0, 0))),
        scratch_shapes=[pltpu.VMEM((1, L), jnp.float32)],
        compiler_params=pltpu.CompilerParams(
            dimension_semantics=("parallel", "arbitrary"),
            vmem_limit_bytes=_VMEM_LIMIT_BYTES),
    )(x_bn3, *weights)
    return coarse_row, zfold_row


# --------------------------------------------------------------------------- #
# Kernel 2: fine (folding) decoder.  Features are built in-kernel:             #
#   h1 = relu(W1c @ repeat(coarse) + (grid-offset+bias part) + (z @ W1z))      #
# Carried as (channels, points) so the output block (3, tile_f) is lane-dense. #
# Grid = (B, num_coarse_tiles); both axes fully parallel.                      #
# --------------------------------------------------------------------------- #
def _fine_kernel(coarse_ref, zfold_ref, gfull_ref, w1c, w2, b2, w3, b3, out_ref, *, r):
    bf16 = jnp.bfloat16
    ct = coarse_ref[...]                                   # (3, tc) coarse centers, f32
    tc = ct.shape[1]
    tf = out_ref.shape[1]                                  # tc * r fine points

    # 0/1 "repeat each coarse point r times" matrix built from iota (no HBM traffic,
    # no integer div/mod needed).
    ii = jax.lax.broadcasted_iota(jnp.int32, (tc, tf), 0)
    kk = jax.lax.broadcasted_iota(jnp.int32, (tc, tf), 1)
    rep = ((kk >= ii * r) & (kk < (ii + 1) * r)).astype(jnp.float32)   # (tc, tf)

    center = jnp.dot(ct, rep, preferred_element_type=jnp.float32)     # (3, tf) exact repeat

    h = jnp.dot(w1c[...], center.astype(bf16), preferred_element_type=jnp.float32)
    h = _relu(h + gfull_ref[...] + zfold_ref[...])                     # (fh, tf)
    h = _relu(jnp.dot(w2[...], h.astype(bf16), preferred_element_type=jnp.float32) + b2[...])
    out_ref[...] = (jnp.dot(w3[...], h.astype(bf16), preferred_element_type=jnp.float32)
                    + b3[...] + center)                                # (3, tf) lane-dense


def _decode_fine(coarse3, zfold_col, kp, r):
    B, _, num_coarse = coarse3.shape
    tc = _pick_coarse_tile(num_coarse, r)
    tf = tc * r
    nt = num_coarse // tc
    num_fine = num_coarse * r
    fh = kp["fold_gb1"].shape[0]

    # (fh, tf): grid-offset + bias contribution; periodic with period r -> tile it once.
    gfull = jnp.tile(kp["fold_gb1"], (1, tc))

    weights = [kp["fold_w1cT"], kp["fold_w2T"], kp["fold_b2T"], kp["fold_w3T"], kp["fold_b3T"]]
    fine3 = pl.pallas_call(
        functools.partial(_fine_kernel, r=r),
        out_shape=jax.ShapeDtypeStruct((B, 3, num_fine), jnp.float32),
        grid=(B, nt),
        in_specs=[pl.BlockSpec((None, 3, tc), lambda b, t: (b, 0, t)),
                  pl.BlockSpec((None, fh, 1), lambda b, t: (b, 0, 0)),
                  _bcast_spec(gfull)]
        + [_bcast_spec(a) for a in weights],
        out_specs=pl.BlockSpec((None, 3, tf), lambda b, t: (b, 0, t)),
        compiler_params=pltpu.CompilerParams(
            dimension_semantics=("parallel", "parallel"),
            vmem_limit_bytes=_VMEM_LIMIT_BYTES),
    )(coarse3, zfold_col, gfull, *weights)
    return fine3


# --------------------------------------------------------------------------- #
# Parameter preparation (layout + bf16 casts for matmul operands).             #
# --------------------------------------------------------------------------- #
def _prepare_kernel_params(p, grid_size):
    bf16 = jnp.bfloat16
    f32 = jnp.float32
    kp = {}
    for i in range(1, 5):
        kp[f"enc_w{i}"] = p[f"enc_w{i}"].astype(bf16)
        kp[f"enc_b{i}"] = p[f"enc_b{i}"].astype(f32)
    for i in range(1, 4):
        kp[f"dec_w{i}"] = p[f"dec_w{i}"].astype(bf16)
        kp[f"dec_b{i}"] = p[f"dec_b{i}"].astype(f32)

    w1 = p["fold_w1"]                                           # (2 + 3 + L, fh)
    # folding grid offsets (same construction as the reference): (r, 2)
    lin = jnp.linspace(-0.05, 0.05, grid_size, dtype=f32)
    gy, gx = jnp.meshgrid(lin, lin, indexing="ij")
    gpts = jnp.stack([gx.ravel(), gy.ravel()], axis=-1)          # (r, 2)
    # per-grid-cell (grid @ W1_grid + b1) contribution, transposed to (fh, r)
    kp["fold_gb1"] = (gpts @ w1[:2] + p["fold_b1"]).astype(f32).T
    kp["fold_w1cT"] = w1[2:5].T.astype(bf16)                     # (fh, 3)
    kp["fold_w1z"] = w1[5:].astype(bf16)                         # (L, fh)
    kp["fold_w2T"] = p["fold_w2"].T.astype(bf16)                 # (fh, fh)
    kp["fold_b2T"] = p["fold_b2"].T.astype(f32)                  # (fh, 1)
    kp["fold_w3T"] = p["fold_w3"].T.astype(bf16)                 # (3, fh)
    kp["fold_b3T"] = p["fold_b3"].T.astype(f32)                  # (3, 1)
    return kp


# --------------------------------------------------------------------------- #
# Full module forward                                                          #
# --------------------------------------------------------------------------- #
def point_cloud_completion(x_ncw, params, *, num_coarse, num_fine, grid_size):
    """x_ncw: (B, 3, N) float32 (PyTorch Conv1d layout).  Returns (coarse, fine)."""
    r = grid_size * grid_size
    assert num_fine == num_coarse * r, "num_fine must equal num_coarse * grid_size**2"
    B = x_ncw.shape[0]

    kp = _prepare_kernel_params(params, grid_size)

    x_bn3 = jnp.transpose(x_ncw, (0, 2, 1))                 # (B, N, 3) rows for the encoder
    coarse_row, zfold_row = _encode_and_coarse(x_bn3, kp)   # (B,1,3nc), (B,1,fh)
    coarse = coarse_row.reshape(B, num_coarse, 3)           # module-facing layout

    coarse3 = jnp.transpose(coarse, (0, 2, 1))              # (B, 3, num_coarse)  (tiny)
    zfold_col = jnp.transpose(zfold_row, (0, 2, 1))         # (B, fh, 1)          (tiny)
    fine3 = _decode_fine(coarse3, zfold_col, kp, r)         # (B, 3, num_fine)
    fine = jnp.transpose(fine3, (0, 2, 1))                  # (B, num_fine, 3)
    return coarse, fine


# --------------------------------------------------------------------------- #
# Deterministic parameter init (same logical layout as the original port).     #
# --------------------------------------------------------------------------- #
def init_params(key, latent_dim, num_coarse, grid_size):
    params = {}

    def linear(k, d_in, d_out):
        kw, kb = jax.random.split(k)
        w = jax.random.normal(kw, (d_in, d_out), jnp.float32) / jnp.sqrt(float(d_in))
        b = 0.01 * jax.random.normal(kb, (1, d_out), jnp.float32)
        return w, b

    enc_dims = [3, 32, 64, 128, latent_dim]
    dec_dims = [latent_dim, 128, 128, num_coarse * 3]
    fold_dims = [2 + 3 + latent_dim, 64, 64, 3]

    keys = jax.random.split(key, len(enc_dims) + len(dec_dims) + len(fold_dims) - 3)
    ki = iter(keys)
    for i in range(4):
        w, b = linear(next(ki), enc_dims[i], enc_dims[i + 1])
        params[f"enc_w{i+1}"], params[f"enc_b{i+1}"] = w, b
    for i in range(3):
        w, b = linear(next(ki), dec_dims[i], dec_dims[i + 1])
        params[f"dec_w{i+1}"], params[f"dec_b{i+1}"] = w, b
    for i in range(3):
        w, b = linear(next(ki), fold_dims[i], fold_dims[i + 1])
        params[f"fold_w{i+1}"], params[f"fold_b{i+1}"] = w, b
    return params


if __name__ == "__main__":
    # Small shapes consistent with the module's forward.
    B, N = 2, 256
    latent_dim, num_coarse, grid_size = 64, 64, 2
    num_fine = num_coarse * grid_size * grid_size    # 256

    key = jax.random.PRNGKey(0)
    kx, kparam = jax.random.split(key)
    x = jax.random.normal(kx, (B, 3, N), jnp.float32)   # PyTorch NCW point cloud
    params = init_params(kparam, latent_dim, num_coarse, grid_size)

    fwd = functools.partial(point_cloud_completion,
                            num_coarse=num_coarse, num_fine=num_fine,
                            grid_size=grid_size)
    coarse, fine = jax.jit(fwd)(x, params)
    jax.block_until_ready((coarse, fine))

    assert coarse.shape == (B, num_coarse, 3), coarse.shape
    assert fine.shape == (B, num_fine, 3), fine.shape
    assert jnp.all(jnp.isfinite(coarse)) and jnp.all(jnp.isfinite(fine))
    print("KERNEL_OK")
</pallas_src>

<mosaic_0001>
module attributes {stable_mosaic.version = 11 : i64} {
  func.func @_encoder_coarse_kernel(%arg0: i32, %arg1: i32, %arg2: memref<1x256x3xf32, #tpu.memory_space<vmem>>, %arg3: memref<3x32xbf16, #tpu.memory_space<vmem>>, %arg4: memref<1x32xf32, #tpu.memory_space<vmem>>, %arg5: memref<32x64xbf16, #tpu.memory_space<vmem>>, %arg6: memref<1x64xf32, #tpu.memory_space<vmem>>, %arg7: memref<64x128xbf16, #tpu.memory_space<vmem>>, %arg8: memref<1x128xf32, #tpu.memory_space<vmem>>, %arg9: memref<128x64xbf16, #tpu.memory_space<vmem>>, %arg10: memref<1x64xf32, #tpu.memory_space<vmem>>, %arg11: memref<64x128xbf16, #tpu.memory_space<vmem>>, %arg12: memref<1x128xf32, #tpu.memory_space<vmem>>, %arg13: memref<128x128xbf16, #tpu.memory_space<vmem>>, %arg14: memref<1x128xf32, #tpu.memory_space<vmem>>, %arg15: memref<128x192xbf16, #tpu.memory_space<vmem>>, %arg16: memref<1x192xf32, #tpu.memory_space<vmem>>, %arg17: memref<64x64xbf16, #tpu.memory_space<vmem>>, %arg18: memref<1x1x192xf32, #tpu.memory_space<vmem>>, %arg19: memref<1x1x64xf32, #tpu.memory_space<vmem>>, %arg20: memref<1x64xf32, #tpu.memory_space<vmem>>) attributes {dimension_semantics = [#tpu.dimension_semantics<parallel>, #tpu.dimension_semantics<arbitrary>], iteration_bounds = array<i64: 2, 1>, scalar_prefetch = 0 : i64, scratch_operands = 1 : i64, tpu.core_type = #tpu.core_type<tc>, window_params = [{transform_indices = @transform_0, window_bounds = array<i64: 1, 256, 3>}, {pipeline_mode = #tpu.pipeline_mode<synchronous>, transform_indices = @transform_1, window_bounds = array<i64: 3, 32>}, {pipeline_mode = #tpu.pipeline_mode<synchronous>, transform_indices = @transform_2, window_bounds = array<i64: 1, 32>}, {pipeline_mode = #tpu.pipeline_mode<synchronous>, transform_indices = @transform_3, window_bounds = array<i64: 32, 64>}, {pipeline_mode = #tpu.pipeline_mode<synchronous>, transform_indices = @transform_4, window_bounds = array<i64: 1, 64>}, {pipeline_mode = #tpu.pipeline_mode<synchronous>, transform_indices = @transform_5, window_bounds = array<i64: 64, 128>}, {pipeline_mode = #tpu.pipeline_mode<synchronous>, transform_indices = @transform_6, window_bounds = array<i64: 1, 128>}, {pipeline_mode = #tpu.pipeline_mode<synchronous>, transform_indices = @transform_7, window_bounds = array<i64: 128, 64>}, {pipeline_mode = #tpu.pipeline_mode<synchronous>, transform_indices = @transform_8, window_bounds = array<i64: 1, 64>}, {pipeline_mode = #tpu.pipeline_mode<synchronous>, transform_indices = @transform_9, window_bounds = array<i64: 64, 128>}, {pipeline_mode = #tpu.pipeline_mode<synchronous>, transform_indices = @transform_10, window_bounds = array<i64: 1, 128>}, {pipeline_mode = #tpu.pipeline_mode<synchronous>, transform_indices = @transform_11, window_bounds = array<i64: 128, 128>}, {pipeline_mode = #tpu.pipeline_mode<synchronous>, transform_indices = @transform_12, window_bounds = array<i64: 1, 128>}, {pipeline_mode = #tpu.pipeline_mode<synchronous>, transform_indices = @transform_13, window_bounds = array<i64: 128, 192>}, {pipeline_mode = #tpu.pipeline_mode<synchronous>, transform_indices = @transform_14, window_bounds = array<i64: 1, 192>}, {pipeline_mode = #tpu.pipeline_mode<synchronous>, transform_indices = @transform_15, window_bounds = array<i64: 64, 64>}, {transform_indices = @transform_16, window_bounds = array<i64: 1, 1, 192>}, {transform_indices = @transform_17, window_bounds = array<i64: 1, 1, 64>}]} {
    %c0_i32 = arith.constant 0 : i32
    %0 = arith.cmpi eq, %arg1, %c0_i32 : i32
    %1 = arith.extui %0 : i1 to i32
    %c0_i32_0 = arith.constant 0 : i32
    %2 = arith.cmpi ne, %1, %c0_i32_0 : i32
    scf.if %2 {
      %cst_32 = arith.constant 0xFF800000 : f32
      %43 = vector.broadcast %cst_32 : f32 to vector<1x64xf32>
      %c0_33 = arith.constant 0 : index
      %c0_34 = arith.constant 0 : index
      %44 = vector.load %arg20[%c0_33, %c0_34] : memref<1x64xf32, #tpu.memory_space<vmem>>, vector<1x64xf32>
      tpu.vector_store %arg20[%c0_33, %c0_34], %43 {strides = array<i32>} : memref<1x64xf32, #tpu.memory_space<vmem>>, vector<1x64xf32>,
    } else {
    }
    %c0 = arith.constant 0 : index
    %c0_1 = arith.constant 0 : index
    %c0_2 = arith.constant 0 : index
    %3 = vector.load %arg2[%c0, %c0_1, %c0_2] : memref<1x256x3xf32, #tpu.memory_space<vmem>>, vector<1x256x3xf32>
    %4 = vector.shape_cast %3 : vector<1x256x3xf32> to vector<256x3xf32>
    %5 = arith.truncf %4 : vector<256x3xf32> to vector<256x3xbf16>
    %c0_3 = arith.constant 0 : index
    %c0_4 = arith.constant 0 : index
    %6 = vector.load %arg3[%c0_3, %c0_4] : memref<3x32xbf16, #tpu.memory_space<vmem>>, vector<3x32xbf16>
    %cst = arith.constant dense<0.000000e+00> : vector<256x32xf32>
    %7 = tpu.matmul %5, %6, %cst {dimension_numbers = #tpu.dot_dimension_numbers<[1], [0], [0], [1], [0, 0, 1, 1], [], []>} : vector<256x3xbf16>, vector<3x32xbf16>, vector<256x32xf32> -> vector<256x32xf32>
    %c0_5 = arith.constant 0 : index
    %c0_6 = arith.constant 0 : index
    %8 = vector.load %arg4[%c0_5, %c0_6] : memref<1x32xf32, #tpu.memory_space<vmem>>, vector<1x32xf32>
    %9 = vector.broadcast %8 : vector<1x32xf32> to vector<256x32xf32>
    %10 = arith.addf %7, %9 : vector<256x32xf32>
    %cst_7 = arith.constant 0.000000e+00 : f32
    %11 = vector.broadcast %cst_7 : f32 to vector<256x32xf32>
    %12 = arith.maximumf %10, %11 : vector<256x32xf32>
    %13 = arith.truncf %12 : vector<256x32xf32> to vector<256x32xbf16>
    %c0_8 = arith.constant 0 : index
    %c0_9 = arith.constant 0 : index
    %14 = vector.load %arg5[%c0_8, %c0_9] : memref<32x64xbf16, #tpu.memory_space<vmem>>, vector<32x64xbf16>
    %cst_10 = arith.constant dense<0.000000e+00> : vector<256x64xf32>
    %15 = tpu.matmul %13, %14, %cst_10 {dimension_numbers = #tpu.dot_dimension_numbers<[1], [0], [0], [1], [0, 0, 1, 1], [], []>} : vector<256x32xbf16>, vector<32x64xbf16>, vector<256x64xf32> -> vector<256x64xf32>
    %c0_11 = arith.constant 0 : index
    %c0_12 = arith.constant 0 : index
    %16 = vector.load %arg6[%c0_11, %c0_12] : memref<1x64xf32, #tpu.memory_space<vmem>>, vector<1x64xf32>
    %17 = vector.broadcast %16 : vector<1x64xf32> to vector<256x64xf32>
    %18 = arith.addf %15, %17 : vector<256x64xf32>
    %cst_13 = arith.constant 0.000000e+00 : f32
    %19 = vector.broadcast %cst_13 : f32 to vector<256x64xf32>
    %20 = arith.maximumf %18, %19 : vector<256x64xf32>
    %21 = arith.truncf %20 : vector<256x64xf32> to vector<256x64xbf16>
    %c0_14 = arith.constant 0 : index
    %c0_15 = arith.constant 0 : index
    %22 = vector.load %arg7[%c0_14, %c0_15] : memref<64x128xbf16, #tpu.memory_space<vmem>>, vector<64x128xbf16>
    %cst_16 = arith.constant dense<0.000000e+00> : vector<256x128xf32>
    %23 = tpu.matmul %21, %22, %cst_16 {dimension_numbers = #tpu.dot_dimension_numbers<[1], [0], [0], [1], [0, 0, 1, 1], [], []>} : vector<256x64xbf16>, vector<64x128xbf16>, vector<256x128xf32> -> vector<256x128xf32>
    %c0_17 = arith.constant 0 : index
    %c0_18 = arith.constant 0 : index
    %24 = vector.load %arg8[%c0_17, %c0_18] : memref<1x128xf32, #tpu.memory_space<vmem>>, vector<1x128xf32>
    %25 = vector.broadcast %24 : vector<1x128xf32> to vector<256x128xf32>
    %26 = arith.addf %23, %25 : vector<256x128xf32>
    %cst_19 = arith.constant 0.000000e+00 : f32
    %27 = vector.broadcast %cst_19 : f32 to vector<256x128xf32>
    %28 = arith.maximumf %26, %27 : vector<256x128xf32>
    %29 = arith.truncf %28 : vector<256x128xf32> to vector<256x128xbf16>
    %c0_20 = arith.constant 0 : index
    %c0_21 = arith.constant 0 : index
    %30 = vector.load %arg9[%c0_20, %c0_21] : memref<128x64xbf16, #tpu.memory_space<vmem>>, vector<128x64xbf16>
    %cst_22 = arith.constant dense<0.000000e+00> : vector<256x64xf32>
    %31 = tpu.matmul %29, %30, %cst_22 {dimension_numbers = #tpu.dot_dimension_numbers<[1], [0], [0], [1], [0, 0, 1, 1], [], []>} : vector<256x128xbf16>, vector<128x64xbf16>, vector<256x64xf32> -> vector<256x64xf32>
    %c0_23 = arith.constant 0 : index
    %c0_24 = arith.constant 0 : index
    %32 = vector.load %arg10[%c0_23, %c0_24] : memref<1x64xf32, #tpu.memory_space<vmem>>, vector<1x64xf32>
    %33 = vector.broadcast %32 : vector<1x64xf32> to vector<256x64xf32>
    %34 = arith.addf %31, %33 : vector<256x64xf32>
    %c0_25 = arith.constant 0 : index
    %c0_26 = arith.constant 0 : index
    %35 = vector.load %arg20[%c0_25, %c0_26] : memref<1x64xf32, #tpu.memory_space<vmem>>, vector<1x64xf32>
    %cst_27 = arith.constant dense<0xFF800000> : vector<64xf32>
    %36 = vector.multi_reduction <maximumf>, %34, %cst_27 [0] : vector<256x64xf32> to vector<64xf32>
    %37 = vector.shape_cast %36 : vector<64xf32> to vector<1x64xf32>
    %38 = arith.maximumf %35, %37 : vector<1x64xf32>
    %c0_28 = arith.constant 0 : index
    %c0_29 = arith.constant 0 : index
    %39 = vector.load %arg20[%c0_28, %c0_29] : memref<1x64xf32, #tpu.memory_space<vmem>>, vector<1x64xf32>
    tpu.vector_store %arg20[%c0_28, %c0_29], %38 {strides = array<i32>} : memref<1x64xf32, #tpu.memory_space<vmem>>, vector<1x64xf32>,
    %c0_i32_30 = arith.constant 0 : i32
    %40 = arith.cmpi eq, %arg1, %c0_i32_30 : i32
    %41 = arith.extui %40 : i1 to i32
    %c0_i32_31 = arith.constant 0 : i32
    %42 = arith.cmpi ne, %41, %c0_i32_31 : i32
    scf.if %42 {
      %c0_32 = arith.constant 0 : index
      %c0_33 = arith.constant 0 : index
      %43 = vector.load %arg20[%c0_32, %c0_33] : memref<1x64xf32, #tpu.memory_space<vmem>>, vector<1x64xf32>
      %44 = arith.truncf %43 : vector<1x64xf32> to vector<1x64xbf16>
      %c0_34 = arith.constant 0 : index
      %c0_35 = arith.constant 0 : index
      %45 = vector.load %arg11[%c0_34, %c0_35] : memref<64x128xbf16, #tpu.memory_space<vmem>>, vector<64x128xbf16>
      %cst_36 = arith.constant dense<0.000000e+00> : vector<1x128xf32>
      %46 = tpu.matmul %44, %45, %cst_36 {dimension_numbers = #tpu.dot_dimension_numbers<[1], [0], [0], [1], [0, 0, 1, 1], [], []>} : vector<1x64xbf16>, vector<64x128xbf16>, vector<1x128xf32> -> vector<1x128xf32>
      %c0_37 = arith.constant 0 : index
      %c0_38 = arith.constant 0 : index
      %47 = vector.load %arg12[%c0_37, %c0_38] : memref<1x128xf32, #tpu.memory_space<vmem>>, vector<1x128xf32>
      %48 = arith.addf %46, %47 : vector<1x128xf32>
      %cst_39 = arith.constant 0.000000e+00 : f32
      %49 = vector.broadcast %cst_39 : f32 to vector<1x128xf32>
      %50 = arith.maximumf %48, %49 : vector<1x128xf32>
      %51 = arith.truncf %50 : vector<1x128xf32> to vector<1x128xbf16>
      %c0_40 = arith.constant 0 : index
      %c0_41 = arith.constant 0 : index
      %52 = vector.load %arg13[%c0_40, %c0_41] : memref<128x128xbf16, #tpu.memory_space<vmem>>, vector<128x128xbf16>
      %cst_42 = arith.constant dense<0.000000e+00> : vector<1x128xf32>
      %53 = tpu.matmul %51, %52, %cst_42 {dimension_numbers = #tpu.dot_dimension_numbers<[1], [0], [0], [1], [0, 0, 1, 1], [], []>} : vector<1x128xbf16>, vector<128x128xbf16>, vector<1x128xf32> -> vector<1x128xf32>
      %c0_43 = arith.constant 0 : index
      %c0_44 = arith.constant 0 : index
      %54 = vector.load %arg14[%c0_43, %c0_44] : memref<1x128xf32, #tpu.memory_space<vmem>>, vector<1x128xf32>
      %55 = arith.addf %53, %54 : vector<1x128xf32>
      %cst_45 = arith.constant 0.000000e+00 : f32
      %56 = vector.broadcast %cst_45 : f32 to vector<1x128xf32>
      %57 = arith.maximumf %55, %56 : vector<1x128xf32>
      %58 = arith.truncf %57 : vector<1x128xf32> to vector<1x128xbf16>
      %c0_46 = arith.constant 0 : index
      %c0_47 = arith.constant 0 : index
      %59 = vector.load %arg15[%c0_46, %c0_47] : memref<128x192xbf16, #tpu.memory_space<vmem>>, vector<128x192xbf16>
      %cst_48 = arith.constant dense<0.000000e+00> : vector<1x192xf32>
      %60 = tpu.matmul %58, %59, %cst_48 {dimension_numbers = #tpu.dot_dimension_numbers<[1], [0], [0], [1], [0, 0, 1, 1], [], []>} : vector<1x128xbf16>, vector<128x192xbf16>, vector<1x192xf32> -> vector<1x192xf32>
      %c0_49 = arith.constant 0 : index
      %c0_50 = arith.constant 0 : index
      %61 = vector.load %arg16[%c0_49, %c0_50] : memref<1x192xf32, #tpu.memory_space<vmem>>, vector<1x192xf32>
      %62 = arith.addf %60, %61 : vector<1x192xf32>
      %c0_51 = arith.constant 0 : index
      %c0_52 = arith.constant 0 : index
      %c0_53 = arith.constant 0 : index
      %63 = vector.load %arg18[%c0_51, %c0_52, %c0_53] : memref<1x1x192xf32, #tpu.memory_space<vmem>>, vector<1x1x192xf32>
      %64 = vector.shape_cast %63 : vector<1x1x192xf32> to vector<1x192xf32>
      %65 = vector.shape_cast %62 : vector<1x192xf32> to vector<1x1x192xf32>
      tpu.vector_store %arg18[%c0_51, %c0_52, %c0_53], %65 {strides = array<i32>} : memref<1x1x192xf32, #tpu.memory_space<vmem>>, vector<1x1x192xf32>,
      %c0_54 = arith.constant 0 : index
      %c0_55 = arith.constant 0 : index
      %66 = vector.load %arg17[%c0_54, %c0_55] : memref<64x64xbf16, #tpu.memory_space<vmem>>, vector<64x64xbf16>
      %cst_56 = arith.constant dense<0.000000e+00> : vector<1x64xf32>
      %67 = tpu.matmul %44, %66, %cst_56 {dimension_numbers = #tpu.dot_dimension_numbers<[1], [0], [0], [1], [0, 0, 1, 1], [], []>} : vector<1x64xbf16>, vector<64x64xbf16>, vector<1x64xf32> -> vector<1x64xf32>
      %c0_57 = arith.constant 0 : index
      %c0_58 = arith.constant 0 : index
      %c0_59 = arith.constant 0 : index
      %68 = vector.load %arg19[%c0_57, %c0_58, %c0_59] : memref<1x1x64xf32, #tpu.memory_space<vmem>>, vector<1x1x64xf32>
      %69 = vector.shape_cast %68 : vector<1x1x64xf32> to vector<1x64xf32>
      %70 = vector.shape_cast %67 : vector<1x64xf32> to vector<1x1x64xf32>
      tpu.vector_store %arg19[%c0_57, %c0_58, %c0_59], %70 {strides = array<i32>} : memref<1x1x64xf32, #tpu.memory_space<vmem>>, vector<1x1x64xf32>,
    } else {
    }
    return
  }
  func.func @transform_0(%arg0: i32, %arg1: i32) -> (i32, i32, i32) {
    %c0_i32 = arith.constant 0 : i32
    %c0_i32_0 = arith.constant 0 : i32
    return %arg0, %arg1, %c0_i32 : i32, i32, i32
  }
  func.func @transform_1(%arg0: i32, %arg1: i32) -> (i32, i32) {
    %c0_i32 = arith.constant 0 : i32
    %c0_i32_0 = arith.constant 0 : i32
    %c0_i32_1 = arith.constant 0 : i32
    return %c0_i32, %c0_i32_0 : i32, i32
  }
  func.func @transform_2(%arg0: i32, %arg1: i32) -> (i32, i32) {
    %c0_i32 = arith.constant 0 : i32
    %c0_i32_0 = arith.constant 0 : i32
    %c0_i32_1 = arith.constant 0 : i32
    return %c0_i32, %c0_i32_0 : i32, i32
  }
  func.func @transform_3(%arg0: i32, %arg1: i32) -> (i32, i32) {
    %c0_i32 = arith.constant 0 : i32
    %c0_i32_0 = arith.constant 0 : i32
    %c0_i32_1 = arith.constant 0 : i32
    return %c0_i32, %c0_i32_0 : i32, i32
  }
  func.func @transform_4(%arg0: i32, %arg1: i32) -> (i32, i32) {
    %c0_i32 = arith.constant 0 : i32
    %c0_i32_0 = arith.constant 0 : i32
    %c0_i32_1 = arith.constant 0 : i32
    return %c0_i32, %c0_i32_0 : i32, i32
  }
  func.func @transform_5(%arg0: i32, %arg1: i32) -> (i32, i32) {
    %c0_i32 = arith.constant 0 : i32
    %c0_i32_0 = arith.constant 0 : i32
    %c0_i32_1 = arith.constant 0 : i32
    return %c0_i32, %c0_i32_0 : i32, i32
  }
  func.func @transform_6(%arg0: i32, %arg1: i32) -> (i32, i32) {
    %c0_i32 = arith.constant 0 : i32
    %c0_i32_0 = arith.constant 0 : i32
    %c0_i32_1 = arith.constant 0 : i32
    return %c0_i32, %c0_i32_0 : i32, i32
  }
  func.func @transform_7(%arg0: i32, %arg1: i32) -> (i32, i32) {
    %c0_i32 = arith.constant 0 : i32
    %c0_i32_0 = arith.constant 0 : i32
    %c0_i32_1 = arith.constant 0 : i32
    return %c0_i32, %c0_i32_0 : i32, i32
  }
  func.func @transform_8(%arg0: i32, %arg1: i32) -> (i32, i32) {
    %c0_i32 = arith.constant 0 : i32
    %c0_i32_0 = arith.constant 0 : i32
    %c0_i32_1 = arith.constant 0 : i32
    return %c0_i32, %c0_i32_0 : i32, i32
  }
  func.func @transform_9(%arg0: i32, %arg1: i32) -> (i32, i32) {
    %c0_i32 = arith.constant 0 : i32
    %c0_i32_0 = arith.constant 0 : i32
    %c0_i32_1 = arith.constant 0 : i32
    return %c0_i32, %c0_i32_0 : i32, i32
  }
  func.func @transform_10(%arg0: i32, %arg1: i32) -> (i32, i32) {
    %c0_i32 = arith.constant 0 : i32
    %c0_i32_0 = arith.constant 0 : i32
    %c0_i32_1 = arith.constant 0 : i32
    return %c0_i32, %c0_i32_0 : i32, i32
  }
  func.func @transform_11(%arg0: i32, %arg1: i32) -> (i32, i32) {
    %c0_i32 = arith.constant 0 : i32
    %c0_i32_0 = arith.constant 0 : i32
    %c0_i32_1 = arith.constant 0 : i32
    return %c0_i32, %c0_i32_0 : i32, i32
  }
  func.func @transform_12(%arg0: i32, %arg1: i32) -> (i32, i32) {
    %c0_i32 = arith.constant 0 : i32
    %c0_i32_0 = arith.constant 0 : i32
    %c0_i32_1 = arith.constant 0 : i32
    return %c0_i32, %c0_i32_0 : i32, i32
  }
  func.func @transform_13(%arg0: i32, %arg1: i32) -> (i32, i32) {
    %c0_i32 = arith.constant 0 : i32
    %c0_i32_0 = arith.constant 0 : i32
    %c0_i32_1 = arith.constant 0 : i32
    return %c0_i32, %c0_i32_0 : i32, i32
  }
  func.func @transform_14(%arg0: i32, %arg1: i32) -> (i32, i32) {
    %c0_i32 = arith.constant 0 : i32
    %c0_i32_0 = arith.constant 0 : i32
    %c0_i32_1 = arith.constant 0 : i32
    return %c0_i32, %c0_i32_0 : i32, i32
  }
  func.func @transform_15(%arg0: i32, %arg1: i32) -> (i32, i32) {
    %c0_i32 = arith.constant 0 : i32
    %c0_i32_0 = arith.constant 0 : i32
    %c0_i32_1 = arith.constant 0 : i32
    return %c0_i32, %c0_i32_0 : i32, i32
  }
  func.func @transform_16(%arg0: i32, %arg1: i32) -> (i32, i32, i32) {
    %c0_i32 = arith.constant 0 : i32
    %c0_i32_0 = arith.constant 0 : i32
    %c0_i32_1 = arith.constant 0 : i32
    return %arg0, %c0_i32, %c0_i32_0 : i32, i32, i32
  }
  func.func @transform_17(%arg0: i32, %arg1: i32) -> (i32, i32, i32) {
    %c0_i32 = arith.constant 0 : i32
    %c0_i32_0 = arith.constant 0 : i32
    %c0_i32_1 = arith.constant 0 : i32
    return %arg0, %c0_i32, %c0_i32_0 : i32, i32, i32
  }
}

module attributes {stable_mosaic.version = 11 : i64} {
  func.func @_fine_kernel(%arg0: i32, %arg1: i32, %arg2: memref<1x3x64xf32, #tpu.memory_space<vmem>>, %arg3: memref<1x64x1xf32, #tpu.memory_space<vmem>>, %arg4: memref<64x256xf32, #tpu.memory_space<vmem>>, %arg5: memref<64x3xbf16, #tpu.memory_space<vmem>>, %arg6: memref<64x64xbf16, #tpu.memory_space<vmem>>, %arg7: memref<64x1xf32, #tpu.memory_space<vmem>>, %arg8: memref<3x64xbf16, #tpu.memory_space<vmem>>, %arg9: memref<3x1xf32, #tpu.memory_space<vmem>>, %arg10: memref<1x3x256xf32, #tpu.memory_space<vmem>>) attributes {dimension_semantics = [#tpu.dimension_semantics<parallel>, #tpu.dimension_semantics<parallel>], iteration_bounds = array<i64: 2, 1>, scalar_prefetch = 0 : i64, scratch_operands = 0 : i64, tpu.core_type = #tpu.core_type<tc>, window_params = [{transform_indices = @transform_0, window_bounds = array<i64: 1, 3, 64>}, {transform_indices = @transform_1, window_bounds = array<i64: 1, 64, 1>}, {pipeline_mode = #tpu.pipeline_mode<synchronous>, transform_indices = @transform_2, window_bounds = array<i64: 64, 256>}, {pipeline_mode = #tpu.pipeline_mode<synchronous>, transform_indices = @transform_3, window_bounds = array<i64: 64, 3>}, {pipeline_mode = #tpu.pipeline_mode<synchronous>, transform_indices = @transform_4, window_bounds = array<i64: 64, 64>}, {pipeline_mode = #tpu.pipeline_mode<synchronous>, transform_indices = @transform_5, window_bounds = array<i64: 64, 1>}, {pipeline_mode = #tpu.pipeline_mode<synchronous>, transform_indices = @transform_6, window_bounds = array<i64: 3, 64>}, {pipeline_mode = #tpu.pipeline_mode<synchronous>, transform_indices = @transform_7, window_bounds = array<i64: 3, 1>}, {transform_indices = @transform_8, window_bounds = array<i64: 1, 3, 256>}]} {
    %c0 = arith.constant 0 : index
    %c0_0 = arith.constant 0 : index
    %c0_1 = arith.constant 0 : index
    %0 = vector.load %arg2[%c0, %c0_0, %c0_1] : memref<1x3x64xf32, #tpu.memory_space<vmem>>, vector<1x3x64xf32>
    %1 = vector.shape_cast %0 : vector<1x3x64xf32> to vector<3x64xf32>
    %2 = tpu.iota {dimensions = array<i32: 0>} : vector<64x256xi32>
    %3 = tpu.iota {dimensions = array<i32: 1>} : vector<64x256xi32>
    %c4_i32 = arith.constant 4 : i32
    %4 = vector.broadcast %c4_i32 : i32 to vector<64x256xi32>
    %5 = arith.muli %2, %4 : vector<64x256xi32>
    %6 = arith.cmpi sge, %3, %5 : vector<64x256xi32>
    %c1_i32 = arith.constant 1 : i32
    %7 = vector.broadcast %c1_i32 : i32 to vector<64x256xi32>
    %8 = arith.addi %2, %7 : vector<64x256xi32>
    %c4_i32_2 = arith.constant 4 : i32
    %9 = vector.broadcast %c4_i32_2 : i32 to vector<64x256xi32>
    %10 = arith.muli %8, %9 : vector<64x256xi32>
    %11 = arith.cmpi slt, %3, %10 : vector<64x256xi32>
    %12 = arith.andi %6, %11 : vector<64x256xi1>
    %13 = arith.extui %12 : vector<64x256xi1> to vector<64x256xi32>
    %14 = arith.sitofp %13 : vector<64x256xi32> to vector<64x256xf32>
    %cst = arith.constant dense<0.000000e+00> : vector<3x256xf32>
    %15 = tpu.matmul %1, %14, %cst {dimension_numbers = #tpu.dot_dimension_numbers<[1], [0], [0], [1], [0, 0, 1, 1], [], []>} : vector<3x64xf32>, vector<64x256xf32>, vector<3x256xf32> -> vector<3x256xf32>
    %c0_3 = arith.constant 0 : index
    %c0_4 = arith.constant 0 : index
    %16 = vector.load %arg5[%c0_3, %c0_4] : memref<64x3xbf16, #tpu.memory_space<vmem>>, vector<64x3xbf16>
    %17 = arith.truncf %15 : vector<3x256xf32> to vector<3x256xbf16>
    %cst_5 = arith.constant dense<0.000000e+00> : vector<64x256xf32>
    %18 = tpu.matmul %16, %17, %cst_5 {dimension_numbers = #tpu.dot_dimension_numbers<[1], [0], [0], [1], [0, 0, 1, 1], [], []>} : vector<64x3xbf16>, vector<3x256xbf16>, vector<64x256xf32> -> vector<64x256xf32>
    %c0_6 = arith.constant 0 : index
    %c0_7 = arith.constant 0 : index
    %19 = vector.load %arg4[%c0_6, %c0_7] : memref<64x256xf32, #tpu.memory_space<vmem>>, vector<64x256xf32>
    %20 = arith.addf %18, %19 : vector<64x256xf32>
    %c0_8 = arith.constant 0 : index
    %c0_9 = arith.constant 0 : index
    %c0_10 = arith.constant 0 : index
    %21 = vector.load %arg3[%c0_8, %c0_9, %c0_10] : memref<1x64x1xf32, #tpu.memory_space<vmem>>, vector<1x64x1xf32>
    %22 = vector.shape_cast %21 : vector<1x64x1xf32> to vector<64x1xf32>
    %23 = vector.broadcast %22 : vector<64x1xf32> to vector<64x256xf32>
    %24 = arith.addf %20, %23 : vector<64x256xf32>
    %cst_11 = arith.constant 0.000000e+00 : f32
    %25 = vector.broadcast %cst_11 : f32 to vector<64x256xf32>
    %26 = arith.maximumf %24, %25 : vector<64x256xf32>
    %c0_12 = arith.constant 0 : index
    %c0_13 = arith.constant 0 : index
    %27 = vector.load %arg6[%c0_12, %c0_13] : memref<64x64xbf16, #tpu.memory_space<vmem>>, vector<64x64xbf16>
    %28 = arith.truncf %26 : vector<64x256xf32> to vector<64x256xbf16>
    %cst_14 = arith.constant dense<0.000000e+00> : vector<64x256xf32>
    %29 = tpu.matmul %27, %28, %cst_14 {dimension_numbers = #tpu.dot_dimension_numbers<[1], [0], [0], [1], [0, 0, 1, 1], [], []>} : vector<64x64xbf16>, vector<64x256xbf16>, vector<64x256xf32> -> vector<64x256xf32>
    %c0_15 = arith.constant 0 : index
    %c0_16 = arith.constant 0 : index
    %30 = vector.load %arg7[%c0_15, %c0_16] : memref<64x1xf32, #tpu.memory_space<vmem>>, vector<64x1xf32>
    %31 = vector.broadcast %30 : vector<64x1xf32> to vector<64x256xf32>
    %32 = arith.addf %29, %31 : vector<64x256xf32>
    %cst_17 = arith.constant 0.000000e+00 : f32
    %33 = vector.broadcast %cst_17 : f32 to vector<64x256xf32>
    %34 = arith.maximumf %32, %33 : vector<64x256xf32>
    %c0_18 = arith.constant 0 : index
    %c0_19 = arith.constant 0 : index
    %35 = vector.load %arg8[%c0_18, %c0_19] : memref<3x64xbf16, #tpu.memory_space<vmem>>, vector<3x64xbf16>
    %36 = arith.truncf %34 : vector<64x256xf32> to vector<64x256xbf16>
    %cst_20 = arith.constant dense<0.000000e+00> : vector<3x256xf32>
    %37 = tpu.matmul %35, %36, %cst_20 {dimension_numbers = #tpu.dot_dimension_numbers<[1], [0], [0], [1], [0, 0, 1, 1], [], []>} : vector<3x64xbf16>, vector<64x256xbf16>, vector<3x256xf32> -> vector<3x256xf32>
    %c0_21 = arith.constant 0 : index
    %c0_22 = arith.constant 0 : index
    %38 = vector.load %arg9[%c0_21, %c0_22] : memref<3x1xf32, #tpu.memory_space<vmem>>, vector<3x1xf32>
    %39 = vector.broadcast %38 : vector<3x1xf32> to vector<3x256xf32>
    %40 = arith.addf %37, %39 : vector<3x256xf32>
    %41 = arith.addf %40, %15 : vector<3x256xf32>
    %c0_23 = arith.constant 0 : index
    %c0_24 = arith.constant 0 : index
    %c0_25 = arith.constant 0 : index
    %42 = vector.load %arg10[%c0_23, %c0_24, %c0_25] : memref<1x3x256xf32, #tpu.memory_space<vmem>>, vector<1x3x256xf32>
    %43 = vector.shape_cast %42 : vector<1x3x256xf32> to vector<3x256xf32>
    %44 = vector.shape_cast %41 : vector<3x256xf32> to vector<1x3x256xf32>
    tpu.vector_store %arg10[%c0_23, %c0_24, %c0_25], %44 {strides = array<i32>} : memref<1x3x256xf32, #tpu.memory_space<vmem>>, vector<1x3x256xf32>,
    return
  }
  func.func @transform_0(%arg0: i32, %arg1: i32) -> (i32, i32, i32) {
    %c0_i32 = arith.constant 0 : i32
    %c0_i32_0 = arith.constant 0 : i32
    return %arg0, %c0_i32, %arg1 : i32, i32, i32
  }
  func.func @transform_1(%arg0: i32, %arg1: i32) -> (i32, i32, i32) {
    %c0_i32 = arith.constant 0 : i32
    %c0_i32_0 = arith.constant 0 : i32
    %c0_i32_1 = arith.constant 0 : i32
    return %arg0, %c0_i32, %c0_i32_0 : i32, i32, i32
  }
  func.func @transform_2(%arg0: i32, %arg1: i32) -> (i32, i32) {
    %c0_i32 = arith.constant 0 : i32
    %c0_i32_0 = arith.constant 0 : i32
    %c0_i32_1 = arith.constant 0 : i32
    return %c0_i32, %c0_i32_0 : i32, i32
  }
  func.func @transform_3(%arg0: i32, %arg1: i32) -> (i32, i32) {
    %c0_i32 = arith.constant 0 : i32
    %c0_i32_0 = arith.constant 0 : i32
    %c0_i32_1 = arith.constant 0 : i32
    return %c0_i32, %c0_i32_0 : i32, i32
  }
  func.func @transform_4(%arg0: i32, %arg1: i32) -> (i32, i32) {
    %c0_i32 = arith.constant 0 : i32
    %c0_i32_0 = arith.constant 0 : i32
    %c0_i32_1 = arith.constant 0 : i32
    return %c0_i32, %c0_i32_0 : i32, i32
  }
  func.func @transform_5(%arg0: i32, %arg1: i32) -> (i32, i32) {
    %c0_i32 = arith.constant 0 : i32
    %c0_i32_0 = arith.constant 0 : i32
    %c0_i32_1 = arith.constant 0 : i32
    return %c0_i32, %c0_i32_0 : i32, i32
  }
  func.func @transform_6(%arg0: i32, %arg1: i32) -> (i32, i32) {
    %c0_i32 = arith.constant 0 : i32
    %c0_i32_0 = arith.constant 0 : i32
    %c0_i32_1 = arith.constant 0 : i32
    return %c0_i32, %c0_i32_0 : i32, i32
  }
  func.func @transform_7(%arg0: i32, %arg1: i32) -> (i32, i32) {
    %c0_i32 = arith.constant 0 : i32
    %c0_i32_0 = arith.constant 0 : i32
    %c0_i32_1 = arith.constant 0 : i32
    return %c0_i32, %c0_i32_0 : i32, i32
  }
  func.func @transform_8(%arg0: i32, %arg1: i32) -> (i32, i32, i32) {
    %c0_i32 = arith.constant 0 : i32
    %c0_i32_0 = arith.constant 0 : i32
    return %arg0, %c0_i32, %arg1 : i32, i32, i32
  }
}

</mosaic_0001>

<bundles_post_ra>
// kernel: point_cloud_completion.3
= control target key start
LH: loop header
LB: loop body
LE: loop exit
PB: predicated region body
PF: predicated region fallthrough
CT: control target
= control target key end

     0   :  { %s1312_s27 = smov 0   ;;  %s1314_s28 = smov 0   ;;  %s1661_s0 = inlined_call_operand.vmem [shape: f32[2,3,64], index: 0, kind: input, shape index: {}]   ;;  %s1662_s1 = inlined_call_operand.vmem [shape: f32[2,64,1], index: 1, kind: input, shape index: {}]   ;;  %s1663_s2 = inlined_call_operand.vmem [shape: f32[64,256], index: 2, kind: input, shape index: {}]   ;;  %s1664_s3 = inlined_call_operand.vmem [shape: bf16[64,3], index: 3, kind: input, shape index: {}]   ;;  %s1665_s4 = inlined_call_operand.vmem [shape: bf16[64,64], index: 4, kind: input, shape index: {}]   ;;  %s1666_s5 = inlined_call_operand.vmem [shape: f32[64,1], index: 5, kind: input, shape index: {}]   ;;  %s1667_s6 = inlined_call_operand.vmem [shape: bf16[3,64], index: 6, kind: input, shape index: {}]   ;;  %s1668_s7 = inlined_call_operand.vmem [shape: f32[3,1], index: 7, kind: input, shape index: {}]   ;;  %s1669_s8 = inlined_call_operand.vmem [shape: f32[2,3,256], index: 8, kind: output, shape index: {}]  }
   0x1   :  { %s1316_s29 = smov 0  }
   0x2 LB: > { %s30_s30 = sadd.s32 1, %s1257_s28  ;;  %p1123_p0 = scmp.ge.s32.totalorder %s1261_s29, 1  ;;  %s1261_s29 = sphi %s1316_s29, %s18_s29   ;;  %s1257_s28 = sphi %s1314_s28, %s1711_s28   ;;  %s1253_s27 = sphi %s1312_s27, %s1710_s27  }
   0x3   : > { %p32_p1 = scmp.ge.s32.totalorder %s30_s30, 2  ;;  %p290_p2 = scmp.lt.s32.totalorder %s1261_s29, 3 }
   0x5   : > { %s1713_s30 = smov (%p32_p1, %s30_s30), 0  ;;  %p291_p3 = pnand %p1123_p0, %p290_p2 }
   0x6   : > { %v359_v0 = vlaneseq (!%p291_p3)  ;;  %v1263_v1 = vmov (!%p291_p3), 0.0   ;;  %v1264_v33 = vmov (!%p291_p3), 1.0|1.0   ;;  %p335_p4 = scmp.lt.s32.totalorder (!%p291_p3), %s1253_s27, 1  ;;  %v1265_v58 = vmov (!%p291_p3), 0   ;;  %v1232_v22 = vld [vmem:[%s1664_s3 + $0x10] sm:$0xff] (!%p291_p3)  }
   0x7   : > { %294 = sbr.rel (%p291_p3) target bundleno = 975 (0x3cf), region = 52  ;;  %543 = vmatprep.mubr.f32.mxu1 (!%p291_p3), %v1263_v1  ;;  %651 = vmatprep.mubr.bf16.mxu0 (!%p291_p3), %v1265_v58  ;;  %v966_v11 = vld [vmem:[%s1668_s7] sm:$0x7] (!%p291_p3)  ;;  %v562_v36 = vld [vmem:[%s1663_s2 + $0x10] sm:$0xff] (!%p291_p3) }
   0x8   : > { %v360_v2 = vshrl.u32 (!%p291_p3), %v359_v0, 7  ;;  %v1332_v3 = vand.u32 (!%p291_p3), 127, %v359_v0  ;;  %1229 = vset.pattern.permute.xlu0 (!%p291_p3), %v1265_v58  ;;  %1230 = vset.pattern.permute.xlu1 (!%p291_p3), %v1265_v58  ;;  %v568_v30 = vld [vmem:[%s1663_s2 + $0x40] sm:$0xff] (!%p291_p3)  ;;  %v570_v37 = vld [vmem:[%s1663_s2 + $0x50] sm:$0xff] (!%p291_p3) }
   0xa   : > { %v361_v4 = vadd.s32 (!%p291_p3), 8, %v360_v2  ;;  %v1335_v5 = vadd.s32 (!%p291_p3), 128, %v1332_v3  ;;  %v371_v6 = vmul.u32 (!%p291_p3), 4, %v360_v2  ;;  %v395_v7 = vadd.s32 (!%p291_p3), 1, %v360_v2 }
   0xb   : > { %v362_v8 = vadd.s32 (!%p291_p3), 16, %v360_v2  ;;  %v363_v9 = vadd.s32 (!%p291_p3), 24, %v360_v2  ;;  %v364_v16 = vadd.s32 (!%p291_p3), 32, %v360_v2  ;;  %v365_v17 = vadd.s32 (!%p291_p3), 40, %v360_v2 }
   0xc   : > { %v372_v10 = vmul.u32 (!%p291_p3), 4, %v361_v4  ;;  %vm1338_vm0 = vcmp.ge.s32.totalorder (!%p291_p3), %v1335_v5, %v371_v6  ;;  %v396_v12 = vadd.s32 (!%p291_p3), 1, %v361_v4  ;;  %v403_v13 = vmul.u32 (!%p291_p3), 4, %v395_v7  ;;  %v789_v4 = vld [vmem:[%s1666_s5 + $0x8] sm:$0xff] (!%p291_p3)  ;;  %v792_v7 = vld [vmem:[%s1666_s5 + $0x20] sm:$0xff] (!%p291_p3) }
   0xd   : > { %vm1343_vm1 = vcmp.ge.s32.totalorder (!%p291_p3), %v1332_v3, %v371_v6  ;;  %v397_v15 = vadd.s32 (!%p291_p3), 1, %v362_v8  ;;  %v373_v21 = vmul.u32 (!%p291_p3), 4, %v362_v8  ;;  %v374_v23 = vmul.u32 (!%p291_p3), 4, %v363_v9  ;;  %v791_v6 = vld [vmem:[%s1666_s5 + $0x18] sm:$0xff] (!%p291_p3)  ;;  %v793_v8 = vld [vmem:[%s1666_s5 + $0x28] sm:$0xff] (!%p291_p3) }
   0xe   : > { %vm1348_vm2 = vcmp.ge.s32.totalorder %v1335_v5, %v372_v10  ;;  %v404_v19 = vmul.u32 4, %v396_v12  ;;  %vm1353_vm3 = vcmp.lt.s32.totalorder %v1335_v5, %v403_v13  ;;  %vm1362_vm5 = vcmp.lt.s32.totalorder %v1332_v3, %v403_v13  ;;  %s1715_s27 = smov (!%p335_p4, %s1253_s27), 1 }
   0xf   : > { %vm428_vm4 = vmand %vm1338_vm0, %vm1353_vm3  ;;  %v398_v24 = vadd.s32 1, %v363_v9  ;;  %vm1368_vm7 = vcmp.ge.s32.totalorder %v1332_v3, %v372_v10  ;;  %v405_v27 = vmul.u32 4, %v397_v15  ;;  %v399_v29 = vadd.s32 1, %v364_v16  ;;  %s1124_s9 = sshll.u32 %s1715_s27, 2  ;;  %s1181_s13 = sshll.u32 %s1715_s27, 6  ;;  %v794_v9 = vld [vmem:[%s1666_s5 + $0x30] sm:$0xff] }
  0x10   : > { %vm414_vm6 = vcmp.lt.s32.totalorder %v1335_v5, %v404_v19  ;;  %vm1373_vm8 = vcmp.lt.s32.totalorder %v1332_v3, %v404_v19  ;;  %vm427_vm9 = vmand %vm1343_vm1, %vm1362_vm5  ;;  %vm1384_vm12 = vcmp.ge.s32.totalorder %v1335_v5, %v373_v21  ;;  %v400_v32 = vadd.s32 1, %v365_v17  ;;  %s341_s12 = scalar_lea.vmem %s1661_s0, %s1124_s9  ;;  %s346_s16 = scalar_lea.vmem %s1662_s1, %s1181_s13  ;;  %v795_v10 = vld [vmem:[%s1666_s5 + $0x38] sm:$0xff] }
  0x11   : > { %vm430_vm10 = vmand %vm1348_vm2, %vm414_vm6  ;;  %v406_v28 = vmul.u32 4, %v398_v24  ;;  %vm1389_vm13 = vcmp.lt.s32.totalorder %v1335_v5, %v405_v27  ;;  %vm1399_vm15 = vcmp.ge.s32.totalorder %v1335_v5, %v374_v23  ;;  %vm1409_vm2 = vcmp.ge.s32.totalorder %v1332_v3, %v373_v21  ;;  %v358_v57 = vld [vmem:[%s341_s12] sm:$0x7]  ;;  %v694_v60 = vld [vmem:[%s346_s16 + $0x10] sm:$0xff]  ;;  %s1182_s13 = sshll.u32 %s1715_s27, 3 }
  0x12   : > { %vm1183_vm11 = vmpackc.low %vm430_vm10, %vm428_vm4  ;;  %vm1414_vm3 = vcmp.lt.s32.totalorder %v1332_v3, %v405_v27  ;;  %v375_v38 = vmul.u32 4, %v364_v16  ;;  %v407_v39 = vmul.u32 4, %v399_v29  ;;  %v366_v42 = vadd.s32 48, %v360_v2  ;;  %v692_v59 = vld [vmem:[%s346_s16] sm:$0xff]  ;;  %712 = vperm.xlu1 %1230, %v694_v60   ;;  %v693_v61 = vld [vmem:[%s346_s16 + $0x8] sm:$0xff] }
  0x13   : > { %1184 = vmatprep.subr.msk.bf16.mxu1 %vm1183_vm11, %v1264_v33  ;;  %vm429_vm14 = vmand %vm1368_vm7, %vm1373_vm8  ;;  %vm1404_vm0 = vcmp.lt.s32.totalorder %v1335_v5, %v406_v28  ;;  %v376_v40 = vmul.u32 4, %v365_v17  ;;  %v408_v41 = vmul.u32 4, %v400_v32  ;;  %v367_v43 = vadd.s32 56, %v360_v2  ;;  %702 = vperm.xlu0 %1229, %v692_v59   ;;  %v695_v62 = vld [vmem:[%s346_s16 + $0x18] sm:$0xff]  ;;  %v696_v63 = vld [vmem:[%s346_s16 + $0x20] sm:$0xff] }
  0x14   : > { %vm1185_vm1 = vmpackc.low %vm429_vm14, %vm427_vm9  ;;  %vm385_vm6 = vcmp.ge.s32.totalorder %v1332_v3, %v374_v23  ;;  %vm417_vm7 = vcmp.lt.s32.totalorder %v1332_v3, %v406_v28  ;;  %v401_v44 = vadd.s32 1, %v366_v42  ;;  %vm1435_vm10 = vcmp.ge.s32.totalorder %v1335_v5, %v375_v38  ;;  %v697_v0 = vld [vmem:[%s346_s16 + $0x28] sm:$0xff]  ;;  %v698_v1 = vld [vmem:[%s346_s16 + $0x30] sm:$0xff] }
  0x15   : > { %1186 = vmatpush1.bf16.msk.msra.mxu1 %vm1185_vm1, %v1264_v33  ;;  %vm432_vm4 = vmand %vm1384_vm12, %vm1389_vm13  ;;  %v402_v45 = vadd.s32 1, %v367_v43  ;;  %vm1440_vm11 = vcmp.lt.s32.totalorder %v1335_v5, %v407_v39  ;;  %vm1445_vm13 = vcmp.ge.s32.totalorder %v1335_v5, %v376_v40  ;;  %vm1450_vm14 = vcmp.lt.s32.totalorder %v1335_v5, %v408_v41  ;;  %v699_v2 = vld [vmem:[%s346_s16 + $0x38] sm:$0xff]  ;;  %v1231_v21 = vld [vmem:[%s1664_s3] sm:$0xff]   ;;  %s355_s16 = scalar_lea.vmem %s1669_s8, %s1182_s13 }
  0x16   : > { %vm434_vm5 = vmand %vm1399_vm15, %vm1404_vm0  ;;  %v377_v50 = vmul.u32 4, %v366_v42  ;;  %v409_v51 = vmul.u32 4, %v401_v44  ;;  %vm1461_vm1 = vcmp.ge.s32.totalorder %v1332_v3, %v375_v38  ;;  %717 = vperm.xlu1 %1230, %v695_v62   ;;  %v1266_v12 = vmov 65535   ;;  %v1233_v23 = vld [vmem:[%s1664_s3 + $0x8] sm:$0xff]   ;;  %v1234_v24 = vld [vmem:[%s1664_s3 + $0x18] sm:$0xff]  }
  0x17   : > { %vm1187_vm8 = vmpackc.low %vm434_vm5, %vm432_vm4  ;;  %v378_v54 = vmul.u32 4, %v367_v43  ;;  %v410_v55 = vmul.u32 4, %v402_v45  ;;  %vm389_vm4 = vcmp.ge.s32.totalorder %v1332_v3, %v376_v40  ;;  %vm421_vm5 = vcmp.lt.s32.totalorder %v1332_v3, %v408_v41  ;;  %707 = vperm.xlu0 %1229, %v693_v61   ;;  %v560_v29 = vld [vmem:[%s1663_s2] sm:$0xff]  ;;  %v561_v32 = vld [vmem:[%s1663_s2 + $0x8] sm:$0xff] }
  0x18   : > { %1188 = vmatprep.subr.msk.bf16.mxu1 %vm1187_vm8, %v1264_v33  ;;  %vm431_vm9 = vmand %vm1409_vm2, %vm1414_vm3  ;;  %vm1466_vm2 = vcmp.lt.s32.totalorder %v1332_v3, %v407_v39  ;;  %vm1487_vm8 = vcmp.ge.s32.totalorder %v1335_v5, %v377_v50  ;;  %v563_v42 = vld [vmem:[%s1663_s2 + $0x18] sm:$0xff] }
  0x19   : > { %vm433_vm12 = vmand %vm385_vm6, %vm417_vm7  ;;  %v571_v43 = vld [vmem:[%s1663_s2 + $0x58] sm:$0xff] }
  0x1a   : > { %vm1189_vm15 = vmpackc.low %vm433_vm12, %vm431_vm9  ;;  %vm424_vm9 = vcmp.lt.s32.totalorder %v1335_v5, %v409_v51  ;;  %vm426_vm12 = vcmp.lt.s32.totalorder %v1335_v5, %v410_v55  ;;  %727 = vperm.xlu1 %1230, %v697_v0  }
  0x1b   : > { %1190 = vmatpush1.bf16.msk.msra.mxu1 %vm1189_vm15, %v1264_v33  ;;  %vm436_vm0 = vmand %vm1435_vm10, %vm1440_vm11  ;;  %vm394_vm11 = vcmp.ge.s32.totalorder %v1335_v5, %v378_v54  ;;  %vm391_vm15 = vcmp.ge.s32.totalorder %v1332_v3, %v377_v50  ;;  %722 = vperm.xlu0 %1229, %v696_v63   ;;  %v790_v5 = vld [vmem:[%s1666_s5 + $0x10] sm:$0xff] }
  0x1c   : > { %vm438_vm3 = vmand %vm1445_vm13, %vm1450_vm14 }
  0x1d   : > { %vm1191_vm6 = vmpackc.low %vm438_vm3, %vm436_vm0  ;;  %vm423_vm0 = vcmp.lt.s32.totalorder %v1332_v3, %v409_v51  ;;  %vm425_vm3 = vcmp.lt.s32.totalorder %v1332_v3, %v410_v55 }
  0x1e   : > { %1192 = vmatprep.subr.msk.bf16.mxu1 %vm1191_vm6, %v1264_v33  ;;  %vm435_vm7 = vmand %vm1461_vm1, %vm1466_vm2  ;;  %vm393_vm2 = vcmp.ge.s32.totalorder %v1332_v3, %v378_v54  ;;  %737 = vperm.xlu1 %1230, %v699_v2   ;;  %v788_v3 = vld [vmem:[%s1666_s5] sm:$0xff] }
  0x1f   : > { %vm437_vm10 = vmand %vm389_vm4, %vm421_vm5  ;;  %732 = vperm.xlu0 %1229, %v698_v1   ;;  %v564_v2 = vld [vmem:[%s1663_s2 + $0x20] sm:$0xff] }
  0x20   : > { %vm1193_vm13 = vmpackc.low %vm437_vm10, %vm435_vm7  ;;  %vm610_vm10 = vcmask 1041408  }
  0x21   : > { %1194 = vmatpush1.bf16.msk.msra.mxu1 %vm1193_vm13, %v1264_v33  ;;  %vm440_vm14 = vmand %vm1487_vm8, %vm424_vm9  ;;  %vm475_vm8 = vcmask 523264   ;;  %vm609_vm9 = vcmask 1040384  }
  0x22   : > { %vm442_vm1 = vmand %vm394_vm11, %vm426_vm12  ;;  %803 = vperm.xlu1 %1230, %v789_v4   ;;  %v611_v13 = vsel %vm609_vm9, 4294967295, %v1266_v12  ;;  %vm596_vm11 = vcmask 23552  }
  0x23   : > { %vm1195_vm4 = vmpackc.low %vm442_vm1, %vm440_vm14  ;;  %798 = vperm.xlu0 %1229, %v788_v3   ;;  %v612_v17 = vsel %vm610_vm10, %v611_v13, 0  ;;  %v572_v3 = vld [vmem:[%s1663_s2 + $0x60] sm:$0xff] }
  0x24   : > { %1196 = vmatprep.subr.msk.bf16.mxu1 %vm1195_vm4, %v1264_v33  ;;  %vm439_vm5 = vmand %vm391_vm15, %vm423_vm0 }
  0x25   : > { %vm441_vm6 = vmand %vm393_vm2, %vm425_vm3 }
  0x26   : > { %vm1197_vm7 = vmpackc.low %vm441_vm6, %vm439_vm5  ;;  %813 = vperm.xlu1 %1230, %v791_v6  }
  0x27   : > { %1198 = vmatpush1.bf16.msk.msra.mxu1 %vm1197_vm7, %v1264_v33  ;;  %808 = vperm.xlu0 %1229, %v790_v5   ;;  %v569_v33 = vld [vmem:[%s1663_s2 + $0x48] sm:$0xff] }
  0x2a   : > { %1161 = vmatmul.mubr.msk.f32.vlgmr.msra.gmra.mrb[0].mxu1 %vm475_vm8, %v358_v57  ;;  %823 = vperm.xlu1 %1230, %v793_v8   ;;  %v565_v8 = vld [vmem:[%s1663_s2 + $0x28] sm:$0xff] }
  0x2b   : > { %671 = vmatprep.mubr.bf16.mxu1 %v1265_v58  ;;  %818 = vperm.xlu0 %1229, %v792_v7  }
  0x2e   : > { %833 = vperm.xlu1 %1230, %v795_v10   ;;  %v566_v10 = vld [vmem:[%s1663_s2 + $0x30] sm:$0xff] }
  0x2f   : > { %828 = vperm.xlu0 %1229, %v794_v9   ;;  %v573_v9 = vld [vmem:[%s1663_s2 + $0x68] sm:$0xff] }
  0x33   : > { %969 = vperm.xlu0 %1229, %v966_v11  }
  0x91   : > { %v1567_v26 = vpop.permute.xlu1 %712 }
  0x92   : > { %v703_v25 = vpop.permute.xlu0 %702 }
  0x95   : > { %v1569_v28 = vpop.permute.xlu1 %717 }
  0x96   : > { %v708_v27 = vpop.permute.xlu0 %707 }
  0x99   : > { %v728_v54 = vpop.permute.xlu1 %727 }
  0x9a   : > { %v723_v31 = vpop.permute.xlu0 %722 }
  0x9e   : > { %v733_v4 = vpop.permute.xlu0 %732 }
  0xfd   : > { %v1543_v14 = vpop.f32.mrb[0].mxu1 }
  0xfe   : > { %v558_v15 = vpack.c.bf16 %v1543_v14, %v1543_v14  ;;  %v1547_v16 = vpop.f32.mrb[1].mxu1 }
  0xff   : > { %v559_v18 = vpack.c.bf16 %v1547_v16, %v1547_v16 }
 0x100   : > { %v614_v20 = vand.u32 %v612_v17, %v558_v15 }
 0x101   : > { %v617_v19 = vand.u32 %v612_v17, %v559_v18  ;;  %v574_v18 = vld [vmem:[%s1663_s2 + $0x70] sm:$0xff] }
 0x103   : > { %619 = vmatprep.subr.bf16.mxu0 %v617_v19  ;;  %1199 = vmatprep.subr.bf16.mxu1 %v617_v19 }
 0x104   : > { %620 = vmatpush1.bf16.msra.mxu0 %v614_v20  ;;  %1200 = vmatpush1.bf16.msra.mxu1 %v614_v20 }
 0x107   : > { %1166 = vmatmul.mubr.msk.bf16.vlgmr.msra.gmra.mrb[0].mxu0 %vm596_vm11, %v1231_v21  ;;  %1168 = vmatmul.mubr.msk.bf16.vlgmr.msra.gmra.mrb[4].mxu1 %vm596_vm11, %v1232_v22 }
 0x108   : > { %661 = vmatprep.mubr.bf16.mxu0 %v1265_v58  ;;  %681 = vmatprep.mubr.bf16.mxu1 %v1265_v58 }
 0x10f   : > { %1167 = vmatmul.mubr.msk.bf16.gmra.mrb[4].mxu0 %vm596_vm11, %v1233_v23  ;;  %1169 = vmatmul.mubr.msk.bf16.gmra.mrb[8].mxu1 %vm596_vm11, %v1234_v24 }
 0x110   : > { %900 = vmatprep.mubr.bf16.mxu0 %v1265_v58  ;;  %1007 = vmatprep.mubr.bf16.mxu1 %v1265_v58 }
 0x1da   : > { %v653_v34 = vpop.f32.mrb[0].mxu0  ;;  %v673_v35 = vpop.f32.mrb[4].mxu1 }
 0x1db   : > { %v654_v38 = vadd.f32 %v653_v34, %v560_v29  ;;  %v674_v39 = vadd.f32 %v673_v35, %v568_v30  ;;  %v655_v40 = vpop.f32.mrb[1].mxu0  ;;  %v675_v41 = vpop.f32.mrb[5].mxu1 }
 0x1dc   : > { %v656_v44 = vadd.f32 %v655_v40, %v561_v32  ;;  %v676_v45 = vadd.f32 %v675_v41, %v569_v33  ;;  %v657_v46 = vpop.f32.mrb[2].mxu0  ;;  %v677_v47 = vpop.f32.mrb[6].mxu1 }
 0x1dd   : > { %v740_v48 = vadd.f32 %v703_v25, %v654_v38  ;;  %v748_v49 = vadd.f32 %v723_v31, %v674_v39  ;;  %v658_v50 = vadd.f32 %v657_v46, %v562_v36  ;;  %v678_v51 = vadd.f32 %v677_v47, %v570_v37  ;;  %v659_v52 = vpop.f32.mrb[3].mxu0  ;;  %v679_v53 = vpop.f32.mrb[7].mxu1 }
 0x1de   : > { %v741_v55 = vadd.f32 %v703_v25, %v656_v44  ;;  %v749_v56 = vadd.f32 %v723_v31, %v676_v45  ;;  %v660_v57 = vadd.f32 %v659_v52, %v563_v42  ;;  %v680_v59 = vadd.f32 %v679_v53, %v571_v43  ;;  %v567_v25 = vld [vmem:[%s1663_s2 + $0x38] sm:$0xff]  ;;  %v738_v41 = vpop.permute.xlu1 %737 }
 0x1df   : > { %v764_v60 = vmax.f32 %v748_v49, 0.0  ;;  %v742_v61 = vadd.f32 %v708_v27, %v658_v50  ;;  %v750_v62 = vadd.f32 %v728_v54, %v678_v51  ;;  %v756_v5 = vmax.f32 %v740_v48, 0.0 }
 0x1e0   : > { %v765_v63 = vmax.f32 %v749_v56, 0.0  ;;  %v743_v0 = vadd.f32 %v708_v27, %v660_v57  ;;  %v751_v1 = vadd.f32 %v728_v54, %v680_v59  ;;  %v757_v11 = vmax.f32 %v741_v55, 0.0  ;;  %v575_v27 = vld [vmem:[%s1663_s2 + $0x78] sm:$0xff] }
 0x1e1   : > { %v758_v6 = vmax.f32 %v742_v61, 0.0  ;;  %v766_v7 = vmax.f32 %v750_v62, 0.0  ;;  %v1236_v62 = vld [vmem:[%s1665_s4 + $0x8] sm:$0xff]  }
 0x1e2   : > { %v759_v12 = vmax.f32 %v743_v0, 0.0  ;;  %v767_v13 = vmax.f32 %v751_v1, 0.0  ;;  %v663_v15 = vpop.f32.mrb[4].mxu0  ;;  %v683_v17 = vpop.f32.mrb[8].mxu1  ;;  %v1238_v0 = vld [vmem:[%s1665_s4 + $0x18] sm:$0xff]  }
 0x1e3   : > { %v780_v19 = vpack.c.bf16 %v758_v6, %v756_v5  ;;  %v784_v20 = vpack.c.bf16 %v766_v7, %v764_v60  ;;  %v664_v21 = vadd.f32 %v663_v15, %v564_v2  ;;  %v684_v22 = vadd.f32 %v683_v17, %v572_v3  ;;  %v665_v23 = vpop.f32.mrb[5].mxu0  ;;  %v685_v24 = vpop.f32.mrb[9].mxu1 }
 0x1e4   : > { %v666_v29 = vadd.f32 %v665_v23, %v565_v8  ;;  %v686_v30 = vadd.f32 %v685_v24, %v573_v9  ;;  %v667_v31 = vpop.f32.mrb[6].mxu0  ;;  %v687_v32 = vpop.f32.mrb[10].mxu1  ;;  %v781_v33 = vpack.c.bf16 %v759_v12, %v757_v11  ;;  %v785_v34 = vpack.c.bf16 %v767_v13, %v765_v63  ;;  %v1237_v63 = vld [vmem:[%s1665_s4 + $0x10] sm:$0xff]  }
 0x1e5   : > { %v744_v35 = vadd.f32 %v1567_v26, %v664_v21  ;;  %v752_v36 = vadd.f32 %v733_v4, %v684_v22  ;;  %v668_v37 = vadd.f32 %v667_v31, %v566_v10  ;;  %v688_v38 = vadd.f32 %v687_v32, %v574_v18  ;;  %v669_v39 = vpop.f32.mrb[7].mxu0  ;;  %v689_v40 = vpop.f32.mrb[11].mxu1 }
 0x1e6   : > { %v745_v42 = vadd.f32 %v1567_v26, %v666_v29  ;;  %v753_v43 = vadd.f32 %v733_v4, %v686_v30  ;;  %v670_v44 = vadd.f32 %v669_v39, %v567_v25  ;;  %v690_v45 = vadd.f32 %v689_v40, %v575_v27  ;;  %868 = vmatprep.subr.bf16.mxu0 %v781_v33  ;;  %v799_v1 = vpop.permute.xlu0 %798  ;;  %v804_v5 = vpop.permute.xlu1 %803 }
 0x1e7   : > { %v746_v46 = vadd.f32 %v1569_v28, %v668_v37  ;;  %v754_v47 = vadd.f32 %v738_v41, %v688_v38  ;;  %869 = vmatpush1.bf16.msra.mxu0 %v780_v19  ;;  %v760_v50 = vmax.f32 %v744_v35, 0.0  ;;  %v768_v51 = vmax.f32 %v752_v36, 0.0 }
 0x1e8   : > { %v747_v48 = vadd.f32 %v1569_v28, %v670_v44  ;;  %v755_v49 = vadd.f32 %v738_v41, %v690_v45  ;;  %v761_v54 = vmax.f32 %v745_v42, 0.0  ;;  %v769_v55 = vmax.f32 %v753_v43, 0.0  ;;  %v1235_v28 = vld [vmem:[%s1665_s4] sm:$0xff]  }
 0x1e9   : > { %v762_v52 = vmax.f32 %v746_v46, 0.0  ;;  %v770_v53 = vmax.f32 %v754_v47, 0.0 }
 0x1ea   : > { %v763_v56 = vmax.f32 %v747_v48, 0.0  ;;  %v771_v57 = vmax.f32 %v755_v49, 0.0  ;;  %v809_v17 = vpop.permute.xlu0 %808  ;;  %v814_v22 = vpop.permute.xlu1 %813 }
 0x1eb   : > { %v782_v26 = vpack.c.bf16 %v762_v52, %v760_v50  ;;  %v786_v59 = vpack.c.bf16 %v770_v53, %v768_v51 }
 0x1ec   : > { %v783_v60 = vpack.c.bf16 %v763_v56, %v761_v54  ;;  %v787_v61 = vpack.c.bf16 %v771_v57, %v769_v55 }
 0x1ee   : > { %870 = vmatprep.subr.bf16.mxu0 %v783_v60  ;;  %v819_v35 = vpop.permute.xlu0 %818  ;;  %v824_v40 = vpop.permute.xlu1 %823 }
 0x1ef   : > { %871 = vmatpush1.bf16.msra.mxu0 %v782_v26 }
 0x1f0   : > { %872 = vmatprep.subr.bf16.mxu0 %v785_v34 }
 0x1f2   : > { %v829_v51 = vpop.permute.xlu0 %828  ;;  %v834_v56 = vpop.permute.xlu1 %833 }
 0x1f3   : > { %873 = vmatpush1.bf16.msra.mxu0 %v784_v20 }
 0x1f4   : > { %874 = vmatprep.subr.bf16.mxu0 %v787_v61 }
 0x1f7   : > { %875 = vmatpush1.bf16.msra.mxu0 %v786_v59 }
 0x1fa   : > { %1174 = vmatmul.mubr.msk.bf16.vlgmr.msra.gmra.mrb[8].mxu0 %vm475_vm8, %v1235_v28 }
 0x1fb   : > { %910 = vmatprep.mubr.bf16.mxu0 %v1265_v58 }
 0x202   : > { %1175 = vmatmul.mubr.msk.bf16.gmra.mrb[12].mxu0 %vm475_vm8, %v1236_v62 }
 0x203   : > { %920 = vmatprep.mubr.bf16.mxu0 %v1265_v58 }
 0x20a   : > { %1176 = vmatmul.mubr.msk.bf16.gmra.mrb[16].mxu0 %vm475_vm8, %v1237_v63 }
 0x20b   : > { %930 = vmatprep.mubr.bf16.mxu0 %v1265_v58 }
 0x212   : > { %1177 = vmatmul.mubr.msk.bf16.gmra.mrb[20].mxu0 %vm475_vm8, %v1238_v0 }
 0x2cd   : > { %v902_v2 = vpop.f32.mrb[8].mxu0 }
 0x2ce   : > { %v903_v3 = vadd.f32 %v902_v2, %v799_v1  ;;  %v904_v4 = vpop.f32.mrb[9].mxu0 }
 0x2cf   : > { %v905_v6 = vadd.f32 %v904_v4, %v799_v1  ;;  %v906_v7 = vpop.f32.mrb[10].mxu0  ;;  %v970_v4 = vpop.permute.xlu0 %969 }
 0x2d0   : > { %v907_v8 = vadd.f32 %v906_v7, %v804_v5  ;;  %v908_v9 = vpop.f32.mrb[11].mxu0  ;;  %v941_v11 = vmax.f32 %v903_v3, 0.0  ;;  %v957_v3 = vld [vmem:[%s1667_s6] sm:$0x3] }
 0x2d1   : > { %v909_v10 = vadd.f32 %v908_v9, %v804_v5  ;;  %v942_v13 = vmax.f32 %v905_v6, 0.0 }
 0x2d2   : > { %v943_v12 = vmax.f32 %v907_v8, 0.0 }
 0x2d3   : > { %v944_v58 = vmax.f32 %v909_v10, 0.0 }
 0x2d4   : > { %v958_v15 = vpack.c.bf16 %v943_v12, %v941_v11 }
 0x2d5   : > { %v959_v18 = vpack.c.bf16 %v944_v58, %v942_v13  ;;  %v912_v19 = vpop.f32.mrb[12].mxu0 }
 0x2d6   : > { %v913_v20 = vadd.f32 %v912_v19, %v809_v17  ;;  %v914_v21 = vpop.f32.mrb[13].mxu0 }
 0x2d7   : > { %v915_v23 = vadd.f32 %v914_v21, %v809_v17  ;;  %v916_v24 = vpop.f32.mrb[14].mxu0  ;;  %975 = vmatprep.subr.bf16.mxu1 %v959_v18 }
 0x2d8   : > { %v917_v25 = vadd.f32 %v916_v24, %v814_v22  ;;  %v918_v27 = vpop.f32.mrb[15].mxu0  ;;  %976 = vmatpush1.bf16.msra.mxu1 %v958_v15  ;;  %v945_v30 = vmax.f32 %v913_v20, 0.0 }
 0x2d9   : > { %v919_v29 = vadd.f32 %v918_v27, %v814_v22  ;;  %v946_v32 = vmax.f32 %v915_v23, 0.0 }
 0x2da   : > { %v947_v31 = vmax.f32 %v917_v25, 0.0 }
 0x2db   : > { %v948_v33 = vmax.f32 %v919_v29, 0.0 }
 0x2dc   : > { %v960_v34 = vpack.c.bf16 %v947_v31, %v945_v30 }
 0x2dd   : > { %v961_v36 = vpack.c.bf16 %v948_v33, %v946_v32  ;;  %v922_v37 = vpop.f32.mrb[16].mxu0 }
 0x2de   : > { %v923_v38 = vadd.f32 %v922_v37, %v819_v35  ;;  %v924_v39 = vpop.f32.mrb[17].mxu0 }
 0x2df   : > { %v925_v41 = vadd.f32 %v924_v39, %v819_v35  ;;  %v926_v42 = vpop.f32.mrb[18].mxu0  ;;  %977 = vmatprep.subr.bf16.mxu1 %v961_v36 }
 0x2e0   : > { %v927_v43 = vadd.f32 %v926_v42, %v824_v40  ;;  %v928_v44 = vpop.f32.mrb[19].mxu0  ;;  %978 = vmatpush1.bf16.msra.mxu1 %v960_v34  ;;  %v949_v46 = vmax.f32 %v923_v38, 0.0 }
 0x2e1   : > { %v929_v45 = vadd.f32 %v928_v44, %v824_v40  ;;  %v950_v48 = vmax.f32 %v925_v41, 0.0 }
 0x2e2   : > { %v951_v47 = vmax.f32 %v927_v43, 0.0 }
 0x2e3   : > { %v952_v49 = vmax.f32 %v929_v45, 0.0 }
 0x2e4   : > { %v962_v50 = vpack.c.bf16 %v951_v47, %v949_v46 }
 0x2e5   : > { %v963_v52 = vpack.c.bf16 %v952_v49, %v950_v48  ;;  %v932_v53 = vpop.f32.mrb[20].mxu0 }
 0x2e6   : > { %v933_v54 = vadd.f32 %v932_v53, %v829_v51  ;;  %v934_v55 = vpop.f32.mrb[21].mxu0 }
 0x2e7   : > { %v935_v57 = vadd.f32 %v934_v55, %v829_v51  ;;  %v936_v26 = vpop.f32.mrb[22].mxu0  ;;  %979 = vmatprep.subr.bf16.mxu1 %v963_v52 }
 0x2e8   : > { %v937_v59 = vadd.f32 %v936_v26, %v834_v56  ;;  %v938_v60 = vpop.f32.mrb[23].mxu0  ;;  %980 = vmatpush1.bf16.msra.mxu1 %v962_v50  ;;  %v953_v28 = vmax.f32 %v933_v54, 0.0 }
 0x2e9   : > { %v939_v61 = vadd.f32 %v938_v60, %v834_v56  ;;  %v954_v63 = vmax.f32 %v935_v57, 0.0 }
 0x2ea   : > { %v955_v62 = vmax.f32 %v937_v59, 0.0 }
 0x2eb   : > { %v956_v0 = vmax.f32 %v939_v61, 0.0 }
 0x2ec   : > { %v964_v1 = vpack.c.bf16 %v955_v62, %v953_v28 }
 0x2ed   : > { %v965_v2 = vpack.c.bf16 %v956_v0, %v954_v63 }
 0x2ef   : > { %981 = vmatprep.subr.bf16.mxu1 %v965_v2 }
 0x2f0   : > { %982 = vmatpush1.bf16.msra.mxu1 %v964_v1 }
 0x2f3   : > { %1178 = vmatmul.mubr.msk.bf16.vlgmr.msra.gmra.mrb[12].mxu1 %vm475_vm8, %v957_v3 }
 0x3c6   : > { %v1009_v5 = vpop.f32.mrb[12].mxu1 }
 0x3c7   : > { %v1010_v6 = vadd.f32 %v1009_v5, %v970_v4  ;;  %v1011_v7 = vpop.f32.mrb[13].mxu1 }
 0x3c8   : > { %v1012_v8 = vadd.f32 %v1011_v7, %v970_v4  ;;  %v1013_v9 = vpop.f32.mrb[14].mxu1 }
 0x3c9   : > { %v1016_v10 = vadd.f32 %v1010_v6, %v1543_v14  ;;  %v1014_v11 = vpop.f32.mrb[15].mxu1 }
 0x3ca   : > { %v1017_v12 = vadd.f32 %v1012_v8, %v1547_v16 }
 0x3cc   : > { %v1020_v13 = vcombine.low %v1016_v10, %v1017_v12 }
 0x3ce   : > { %1022 = vst [vmem:[%s355_s16] sm:$0x77] %v1020_v13 }
 0x3cf PF: > { %s18_s29 = sadd.s32 1, %s1261_s29   ;;  %s1710_s27 = smov %s1257_s28 }
 0x3d0   : > { %p15_p5 = scmp.ge.s32.totalorder %s18_s29, 4   ;;  %s1711_s28 = smov %s1713_s30 }
 0x3d2   :  { %17 = sbr.rel (!%p15_p5) target bundleno = 2 (0x2), region = 85 }

// kernel: point_cloud_completion.2
= control target key start
LH: loop header
LB: loop body
LE: loop exit
PB: predicated region body
PF: predicated region fallthrough
CT: control target
= control target key end

     0   :  { %s2939_s24 = smov 0   ;;  %s2941_s25 = smov 0   ;;  %s3425_s0 = inlined_call_operand.vmem [shape: f32[2,256,3], index: 0, kind: input, shape index: {}]   ;;  %s3426_s1 = inlined_call_operand.vmem [shape: bf16[3,32], index: 1, kind: input, shape index: {}]   ;;  %s3427_s2 = inlined_call_operand.vmem [shape: f32[1,32], index: 2, kind: input, shape index: {}]   ;;  %s3428_s3 = inlined_call_operand.vmem [shape: bf16[32,64], index: 3, kind: input, shape index: {}]   ;;  %s3429_s4 = inlined_call_operand.vmem [shape: f32[1,64], index: 4, kind: input, shape index: {}]   ;;  %s3430_s5 = inlined_call_operand.vmem [shape: bf16[64,128], index: 5, kind: input, shape index: {}]   ;;  %s3431_s6 = inlined_call_operand.vmem [shape: f32[1,128], index: 6, kind: input, shape index: {}]   ;;  %s3432_s7 = inlined_call_operand.vmem [shape: bf16[128,64], index: 7, kind: input, shape index: {}]   ;;  %s3433_s8 = inlined_call_operand.vmem [shape: f32[1,64], index: 8, kind: input, shape index: {}]   ;;  %s3434_s9 = inlined_call_operand.vmem [shape: bf16[64,128], index: 9, kind: input, shape index: {}]   ;;  %s3435_s10 = inlined_call_operand.vmem [shape: f32[1,128], index: 10, kind: input, shape index: {}]   ;;  %s3436_s11 = inlined_call_operand.vmem [shape: bf16[128,128], index: 11, kind: input, shape index: {}]   ;;  %s3437_s12 = inlined_call_operand.vmem [shape: f32[1,128], index: 12, kind: input, shape index: {}]   ;;  %s3438_s13 = inlined_call_operand.vmem [shape: bf16[128,192], index: 13, kind: input, shape index: {}]   ;;  %s3439_s14 = inlined_call_operand.vmem [shape: f32[1,192], index: 14, kind: input, shape index: {}]   ;;  %s3440_s15 = inlined_call_operand.vmem [shape: bf16[64,64], index: 15, kind: input, shape index: {}]   ;;  %s3441_s16 = inlined_call_operand.vmem [shape: f32[2,1,192], index: 16, kind: output, shape index: {0}]   ;;  %s3442_s17 = inlined_call_operand.vmem [shape: f32[2,1,64], index: 17, kind: output, shape index: {1}]  }
   0x1   :  { %3443 = sst [smem:[#allocation3_spill]] %s3425_s0  ;;  %s2943_s26 = smov 0  }
   0x2   :  { %3444 = sst [smem:[#allocation4_spill]] %s3426_s1 }
   0x3 LB: > { %s40_s27 = sadd.s32 1, %s2837_s25  ;;  %p2326_p0 = scmp.ge.s32.totalorder %s2841_s26, 1  ;;  %s2841_s26 = sphi %s2943_s26, %s28_s26   ;;  %s2837_s25 = sphi %s2941_s25, %s3448_s25   ;;  %s2833_s24 = sphi %s2939_s24, %s3447_s24  }
   0x4   : > { %p42_p1 = scmp.ge.s32.totalorder %s40_s27, 2  ;;  %p509_p2 = scmp.lt.s32.totalorder %s2841_s26, 3 }
   0x6   : > { %s3450_s27 = smov (%p42_p1, %s40_s27), 0  ;;  %p510_p3 = pnand %p2326_p0, %p509_p2 }
   0x7   : > { %s3445_s0 = sld [smem:[#allocation4_spill]] (!%p510_p3)  ;;  %vm696_vm0 = vcmask (!%p510_p3), 1040384   ;;  %vm697_vm1 = vcmask (!%p510_p3), 1041408   ;;  %p568_p4 = scmp.lt.s32.totalorder (!%p510_p3), %s2833_s24, 1  ;;  %v2843_v1 = vmov (!%p510_p3), 65535   ;;  %vm647_vm2 = vcmask (!%p510_p3), 23552  }
   0x8   : > { %513 = sbr.rel (%p510_p3) target bundleno = 1650 (0x672), region = 84  ;;  %v698_v2 = vsel (!%p510_p3), %vm696_vm0, 4294967295, %v2843_v1  ;;  %s3446_s1 = sld [smem:[#allocation3_spill]] (!%p510_p3)  ;;  %v2765_v53 = vld [vmem:[%s3428_s3] sm:$0xff] (!%p510_p3)   ;;  %v2766_v54 = vld [vmem:[%s3428_s3 + $0x8] sm:$0xff] (!%p510_p3)   ;;  %v2769_v57 = vld [vmem:[%s3430_s5 + $0x10] sm:$0xff] (!%p510_p3)  }
   0x9   : > { %v699_v3 = vsel (!%p510_p3), %vm697_vm1, %v698_v2, 0  ;;  %v2767_v55 = vld [vmem:[%s3430_s5] sm:$0xff] (!%p510_p3)   ;;  %v2768_v56 = vld [vmem:[%s3430_s5 + $0x8] sm:$0xff] (!%p510_p3)   ;;  %v2770_v58 = vld [vmem:[%s3430_s5 + $0x18] sm:$0xff] (!%p510_p3)   ;;  %vm935_vm3 = vcmask (!%p510_p3), 261120   ;;  %vm1232_vm4 = vcmask (!%p510_p3), 523264  }
   0xa   : > { %v3037_v59 = vld [vmem:[%s3427_s2] ss:$0 sm:$0xff] (!%p510_p3)  ;;  %vm589_vm5 = vcmask (!%p510_p3), 516096   ;;  %vm2846_vm6 = vmmov (!%p510_p3), 0  }
   0xd   : > { %v639_v0 = vld [vmem:[%s3445_s0] sm:$0x3] (!%p510_p3) }
   0xe   : > { %v701_v4 = vand.u32 (!%p510_p3), %v699_v3, %v639_v0 }
   0xf   : > { %s3452_s24 = smov (!%p568_p4, %s2833_s24), 1 }
  0x10   : > { %s2432_s30 = sshll.u32 %s3452_s24, 8  ;;  %2531 = vmatprep.subr.bf16.mxu0 %v701_v4  ;;  %2733 = vmatprep.subr.bf16.mxu1 %v701_v4  ;;  %s583_s18 = scalar_lea.vmem %s3442_s17, %s3452_s24 }
  0x11   : > { %s2966_s20 = scalar_lea.vmem %s3446_s1, %s2432_s30  ;;  %2532 = vmatpush3.bf16.msra.mxu0 %v701_v4  ;;  %2734 = vmatpush3.bf16.msra.mxu1 %v701_v4 }
  0x12   : > { %v591_v5 = vld [vmem:[%s2966_s20] sm:$0xff]  ;;  %v592_v6 = vld [vmem:[%s2966_s20 + $0x8] sm:$0xff]  ;;  %v593_v7 = vld [vmem:[%s2966_s20 + $0x10] sm:$0xff]  ;;  %2565 = vmatprep.subr.bf16.mxu1 %v2765_v53  ;;  %2601 = vmatprep.subr.bf16.mxu0 %v2767_v55 }
  0x13   : > { %v623_v8 = vpack.c.bf16 %v592_v6, %v591_v5  ;;  %v594_v9 = vld [vmem:[%s2966_s20 + $0x18] sm:$0xff]  ;;  %v595_v10 = vld [vmem:[%s2966_s20 + $0x20] sm:$0xff]  ;;  %v596_v11 = vld [vmem:[%s2966_s20 + $0x28] sm:$0xff] }
  0x14   : > { %v624_v12 = vpack.c.bf16 %v594_v9, %v593_v7  ;;  %v625_v13 = vpack.c.bf16 %v596_v11, %v595_v10  ;;  %v597_v14 = vld [vmem:[%s2966_s20 + $0x30] sm:$0xff]  ;;  %v598_v15 = vld [vmem:[%s2966_s20 + $0x38] sm:$0xff]  ;;  %v599_v16 = vld [vmem:[%s2966_s20 + $0x40] sm:$0xff] }
  0x15   : > { %2533 = vmatprep.mubr.msk.bf16.mxu0 %vm647_vm2, %v623_v8  ;;  %v600_v17 = vld [vmem:[%s2966_s20 + $0x48] sm:$0xff]  ;;  %v626_v18 = vpack.c.bf16 %v598_v15, %v597_v14  ;;  %v619_v20 = vld [vmem:[%s2966_s20 + $0xe0] sm:$0xff]  ;;  %v621_v23 = vld [vmem:[%s2966_s20 + $0xf0] sm:$0xff] }
  0x16   : > { %2534 = vmatmul.mubr.msk.bf16.vlgmr.msra.gmra.mrb[0].mxu0 %vm647_vm2, %v624_v12  ;;  %v627_v19 = vpack.c.bf16 %v600_v17, %v599_v16  ;;  %v620_v21 = vld [vmem:[%s2966_s20 + $0xe8] sm:$0xff]  ;;  %v622_v24 = vld [vmem:[%s2966_s20 + $0xf8] sm:$0xff]  ;;  %v601_v25 = vld [vmem:[%s2966_s20 + $0x50] sm:$0xff] }
  0x17   : > { %2537 = vmatprep.mubr.msk.bf16.mxu0 %vm647_vm2, %v625_v13  ;;  %v637_v22 = vpack.c.bf16 %v620_v21, %v619_v20  ;;  %v602_v26 = vld [vmem:[%s2966_s20 + $0x58] sm:$0xff]  ;;  %v638_v27 = vpack.c.bf16 %v622_v24, %v621_v23  ;;  %v603_v28 = vld [vmem:[%s2966_s20 + $0x60] sm:$0xff]  ;;  %v604_v29 = vld [vmem:[%s2966_s20 + $0x68] sm:$0xff]  ;;  %2602 = vmatpush3.bf16.msra.mxu0 %v2767_v55 }
  0x18   : > { %v628_v30 = vpack.c.bf16 %v602_v26, %v601_v25  ;;  %v629_v31 = vpack.c.bf16 %v604_v29, %v603_v28  ;;  %v605_v32 = vld [vmem:[%s2966_s20 + $0x70] sm:$0xff]  ;;  %v606_v33 = vld [vmem:[%s2966_s20 + $0x78] sm:$0xff]  ;;  %v607_v34 = vld [vmem:[%s2966_s20 + $0x80] sm:$0xff]  ;;  %2603 = vmatprep.subr.bf16.mxu0 %v2768_v56 }
  0x19   : > { %2561 = vmatprep.mubr.msk.bf16.mxu1 %vm647_vm2, %v637_v22  ;;  %v608_v35 = vld [vmem:[%s2966_s20 + $0x88] sm:$0xff]  ;;  %v630_v36 = vpack.c.bf16 %v606_v33, %v605_v32  ;;  %v609_v38 = vld [vmem:[%s2966_s20 + $0x90] sm:$0xff]  ;;  %v610_v39 = vld [vmem:[%s2966_s20 + $0x98] sm:$0xff] }
  0x1a   : > { %2562 = vmatmul.mubr.msk.bf16.vlgmr.msra.gmra.mrb[0].mxu1 %vm647_vm2, %v638_v27  ;;  %v631_v37 = vpack.c.bf16 %v608_v35, %v607_v34  ;;  %v611_v40 = vld [vmem:[%s2966_s20 + $0xa0] sm:$0xff]  ;;  %v612_v41 = vld [vmem:[%s2966_s20 + $0xa8] sm:$0xff]  ;;  %v632_v42 = vpack.c.bf16 %v610_v39, %v609_v38  ;;  %v613_v44 = vld [vmem:[%s2966_s20 + $0xb0] sm:$0xff] }
  0x1b   : > { %v633_v43 = vpack.c.bf16 %v612_v41, %v611_v40  ;;  %v614_v45 = vld [vmem:[%s2966_s20 + $0xb8] sm:$0xff]  ;;  %v615_v46 = vld [vmem:[%s2966_s20 + $0xc0] sm:$0xff]  ;;  %v616_v47 = vld [vmem:[%s2966_s20 + $0xc8] sm:$0xff]  ;;  %2566 = vmatpush3.bf16.msra.mxu1 %v2765_v53  ;;  %2604 = vmatpush3.bf16.msra.mxu0 %v2768_v56 }
  0x1c   : > { %v634_v48 = vpack.c.bf16 %v614_v45, %v613_v44  ;;  %v635_v49 = vpack.c.bf16 %v616_v47, %v615_v46  ;;  %v617_v50 = vld [vmem:[%s2966_s20 + $0xd0] sm:$0xff]  ;;  %v618_v51 = vld [vmem:[%s2966_s20 + $0xd8] sm:$0xff]  ;;  %2567 = vmatprep.subr.bf16.mxu1 %v2766_v54  ;;  %2605 = vmatprep.subr.bf16.mxu0 %v2769_v57  ;;  %s2329_s20 = sshll.u32 %s3452_s24, 1 }
  0x1d   : > { %v636_v52 = vpack.c.bf16 %v618_v51, %v617_v50  ;;  %s580_s23 = scalar_lea.vmem %s3441_s16, %s2329_s20 }
  0x1e   : > { %2538 = vmatmul.mubr.msk.bf16.gmra.mrb[4].mxu0 %vm647_vm2, %v626_v18 }
  0x1f   : > { %2541 = vmatprep.mubr.msk.bf16.mxu0 %vm647_vm2, %v627_v19  ;;  %2568 = vmatpush3.bf16.msra.mxu1 %v2766_v54 }
  0x20   : > { %2606 = vmatpush3.bf16.msra.mxu0 %v2769_v57 }
  0x21   : > { %2607 = vmatprep.subr.bf16.mxu0 %v2770_v58 }
  0x24   : > { %2608 = vmatpush3.bf16.msra.mxu0 %v2770_v58 }
  0x26   : > { %2542 = vmatmul.mubr.msk.bf16.gmra.mrb[8].mxu0 %vm647_vm2, %v628_v30 }
  0x27   : > { %2545 = vmatprep.mubr.msk.bf16.mxu0 %vm647_vm2, %v629_v31 }
  0x2e   : > { %2546 = vmatmul.mubr.msk.bf16.gmra.mrb[12].mxu0 %vm647_vm2, %v630_v36 }
  0x2f   : > { %2549 = vmatprep.mubr.msk.bf16.mxu0 %vm647_vm2, %v631_v37 }
  0x36   : > { %2550 = vmatmul.mubr.msk.bf16.gmra.mrb[16].mxu0 %vm647_vm2, %v632_v42 }
  0x37   : > { %2553 = vmatprep.mubr.msk.bf16.mxu0 %vm647_vm2, %v633_v43 }
  0x3e   : > { %2554 = vmatmul.mubr.msk.bf16.gmra.mrb[20].mxu0 %vm647_vm2, %v634_v48 }
  0x3f   : > { %2557 = vmatprep.mubr.msk.bf16.mxu0 %vm647_vm2, %v635_v49 }
  0x46   : > { %2558 = vmatmul.mubr.msk.bf16.gmra.mrb[24].mxu0 %vm647_vm2, %v636_v52 }
  0xe9   : > { %v2535_v60 = vpop.f32.mrb[0].mxu0 }
  0xea   : > { %v746_v61 = vadd.f32 %v2535_v60, %v3037_v59  ;;  %v737_v62 = vpop.f32.mrb[1].mxu0 }
  0xeb   : > { %v738_v63 = vadd.f32 %v3037_v59, %v737_v62  ;;  %v2536_v0 = vpop.f32.mrb[2].mxu0 }
  0xec   : > { %v749_v1 = vadd.f32 %v2536_v0, %v3037_v59  ;;  %v740_v2 = vpop.f32.mrb[3].mxu0  ;;  %v866_v4 = vmax.f32 %v746_v61, 0.0 }
  0xed   : > { %v741_v3 = vadd.f32 %v3037_v59, %v740_v2  ;;  %v864_v6 = vmax.f32 %v738_v63, 0.0  ;;  %v2563_v13 = vpop.f32.mrb[0].mxu1 }
  0xee   : > { %v867_v5 = vmax.f32 %v749_v1, 0.0  ;;  %v858_v16 = vadd.f32 %v2563_v13, %v3037_v59  ;;  %v849_v17 = vpop.f32.mrb[1].mxu1 }
  0xef   : > { %v865_v7 = vmax.f32 %v741_v3, 0.0  ;;  %v850_v20 = vadd.f32 %v3037_v59, %v849_v17  ;;  %v2564_v21 = vpop.f32.mrb[2].mxu1 }
  0xf0   : > { %v897_v8 = vpack.c.bf16 %v867_v5, %v866_v4  ;;  %v894_v23 = vmax.f32 %v858_v16, 0.0  ;;  %v861_v24 = vadd.f32 %v2564_v21, %v3037_v59  ;;  %v852_v25 = vpop.f32.mrb[3].mxu1 }
  0xf1   : > { %v896_v9 = vpack.c.bf16 %v865_v7, %v864_v6  ;;  %v2539_v10 = vpop.f32.mrb[4].mxu0  ;;  %v892_v28 = vmax.f32 %v850_v20, 0.0  ;;  %v853_v29 = vadd.f32 %v3037_v59, %v852_v25 }
  0xf2   : > { %v762_v11 = vadd.f32 %v2539_v10, %v3037_v59  ;;  %v753_v12 = vpop.f32.mrb[5].mxu0  ;;  %v895_v32 = vmax.f32 %v861_v24, 0.0 }
  0xf3   : > { %v754_v14 = vadd.f32 %v3037_v59, %v753_v12  ;;  %v2540_v15 = vpop.f32.mrb[6].mxu0  ;;  %2569 = vmatprep.mubr.msk.bf16.mxu1 %vm935_vm3, %v896_v9  ;;  %v893_v34 = vmax.f32 %v853_v29, 0.0 }
  0xf4   : > { %v765_v18 = vadd.f32 %v2540_v15, %v3037_v59  ;;  %v756_v19 = vpop.f32.mrb[7].mxu0  ;;  %2570 = vmatmul.mubr.msk.bf16.vlgmr.msra.gmra.mrb[4].mxu1 %vm935_vm3, %v897_v8  ;;  %v870_v26 = vmax.f32 %v762_v11, 0.0  ;;  %v3053_v37 = vpack.c.bf16 %v895_v32, %v894_v23 }
  0xf5   : > { %v757_v22 = vadd.f32 %v3037_v59, %v756_v19  ;;  %v868_v30 = vmax.f32 %v754_v14, 0.0  ;;  %v3056_v40 = vpack.c.bf16 %v893_v34, %v892_v28 }
  0xf6   : > { %v871_v27 = vmax.f32 %v765_v18, 0.0 }
  0xf7   : > { %v869_v31 = vmax.f32 %v757_v22, 0.0 }
  0xf8   : > { %v899_v33 = vpack.c.bf16 %v871_v27, %v870_v26 }
  0xf9   : > { %v898_v35 = vpack.c.bf16 %v869_v31, %v868_v30  ;;  %v2543_v36 = vpop.f32.mrb[8].mxu0 }
  0xfa   : > { %v778_v38 = vadd.f32 %v2543_v36, %v3037_v59  ;;  %v769_v39 = vpop.f32.mrb[9].mxu0 }
  0xfb   : > { %v770_v41 = vadd.f32 %v3037_v59, %v769_v39  ;;  %v2544_v42 = vpop.f32.mrb[10].mxu0  ;;  %2573 = vmatprep.mubr.msk.bf16.mxu1 %vm935_vm3, %v898_v35 }
  0xfc   : > { %v781_v43 = vadd.f32 %v2544_v42, %v3037_v59  ;;  %v772_v44 = vpop.f32.mrb[11].mxu0  ;;  %2574 = vmatmul.mubr.msk.bf16.gmra.mrb[8].mxu1 %vm935_vm3, %v899_v33  ;;  %v874_v46 = vmax.f32 %v778_v38, 0.0 }
  0xfd   : > { %v773_v45 = vadd.f32 %v3037_v59, %v772_v44  ;;  %v872_v48 = vmax.f32 %v770_v41, 0.0 }
  0xfe   : > { %v875_v47 = vmax.f32 %v781_v43, 0.0 }
  0xff   : > { %v873_v49 = vmax.f32 %v773_v45, 0.0 }
 0x100   : > { %v901_v50 = vpack.c.bf16 %v875_v47, %v874_v46  ;;  %v2772_v47 = vld [vmem:[%s3432_s7 + $0x8] sm:$0xff]  }
 0x101   : > { %v900_v51 = vpack.c.bf16 %v873_v49, %v872_v48  ;;  %v2547_v52 = vpop.f32.mrb[12].mxu0  ;;  %v2773_v48 = vld [vmem:[%s3432_s7 + $0x10] sm:$0xff]   ;;  %v2776_v49 = vld [vmem:[%s3432_s7 + $0x28] sm:$0xff]  }
 0x102   : > { %v794_v53 = vadd.f32 %v2547_v52, %v3037_v59  ;;  %v785_v54 = vpop.f32.mrb[13].mxu0 }
 0x103   : > { %v786_v55 = vadd.f32 %v3037_v59, %v785_v54  ;;  %v2548_v56 = vpop.f32.mrb[14].mxu0  ;;  %2577 = vmatprep.mubr.msk.bf16.mxu1 %vm935_vm3, %v900_v51  ;;  %v3117_v51 = vld [vmem:[%s3429_s4] ss:$0 sm:$0xff] }
 0x104   : > { %v797_v57 = vadd.f32 %v2548_v56, %v3037_v59  ;;  %v788_v58 = vpop.f32.mrb[15].mxu0  ;;  %2578 = vmatmul.mubr.msk.bf16.gmra.mrb[12].mxu1 %vm935_vm3, %v901_v50  ;;  %v878_v61 = vmax.f32 %v794_v53, 0.0  ;;  %v2777_v50 = vld [vmem:[%s3432_s7 + $0x30] sm:$0xff]  }
 0x105   : > { %v789_v60 = vadd.f32 %v3037_v59, %v788_v58  ;;  %v876_v63 = vmax.f32 %v786_v55, 0.0 }
 0x106   : > { %v879_v62 = vmax.f32 %v797_v57, 0.0 }
 0x107   : > { %v877_v0 = vmax.f32 %v789_v60, 0.0 }
 0x108   : > { %v903_v1 = vpack.c.bf16 %v879_v62, %v878_v61 }
 0x109   : > { %v902_v2 = vpack.c.bf16 %v877_v0, %v876_v63  ;;  %v2551_v3 = vpop.f32.mrb[16].mxu0 }
 0x10a   : > { %v810_v4 = vadd.f32 %v2551_v3, %v3037_v59  ;;  %v801_v5 = vpop.f32.mrb[17].mxu0 }
 0x10b   : > { %v802_v6 = vadd.f32 %v3037_v59, %v801_v5  ;;  %v2552_v7 = vpop.f32.mrb[18].mxu0  ;;  %2581 = vmatprep.mubr.msk.bf16.mxu1 %vm935_vm3, %v902_v2 }
 0x10c   : > { %v813_v8 = vadd.f32 %v2552_v7, %v3037_v59  ;;  %v804_v9 = vpop.f32.mrb[19].mxu0  ;;  %2582 = vmatmul.mubr.msk.bf16.gmra.mrb[16].mxu1 %vm935_vm3, %v903_v1  ;;  %v882_v11 = vmax.f32 %v810_v4, 0.0 }
 0x10d   : > { %v805_v10 = vadd.f32 %v3037_v59, %v804_v9  ;;  %v880_v13 = vmax.f32 %v802_v6, 0.0 }
 0x10e   : > { %v883_v12 = vmax.f32 %v813_v8, 0.0 }
 0x10f   : > { %v881_v14 = vmax.f32 %v805_v10, 0.0 }
 0x110   : > { %v905_v15 = vpack.c.bf16 %v883_v12, %v882_v11 }
 0x111   : > { %v904_v16 = vpack.c.bf16 %v881_v14, %v880_v13  ;;  %v2555_v17 = vpop.f32.mrb[20].mxu0 }
 0x112   : > { %v826_v18 = vadd.f32 %v2555_v17, %v3037_v59  ;;  %v817_v19 = vpop.f32.mrb[21].mxu0 }
 0x113   : > { %v818_v20 = vadd.f32 %v3037_v59, %v817_v19  ;;  %v2556_v21 = vpop.f32.mrb[22].mxu0  ;;  %2585 = vmatprep.mubr.msk.bf16.mxu1 %vm935_vm3, %v904_v16 }
 0x114   : > { %v829_v22 = vadd.f32 %v2556_v21, %v3037_v59  ;;  %v820_v23 = vpop.f32.mrb[23].mxu0  ;;  %2586 = vmatmul.mubr.msk.bf16.gmra.mrb[20].mxu1 %vm935_vm3, %v905_v15  ;;  %v886_v25 = vmax.f32 %v826_v18, 0.0 }
 0x115   : > { %v821_v24 = vadd.f32 %v3037_v59, %v820_v23  ;;  %v884_v27 = vmax.f32 %v818_v20, 0.0 }
 0x116   : > { %v887_v26 = vmax.f32 %v829_v22, 0.0 }
 0x117   : > { %v885_v28 = vmax.f32 %v821_v24, 0.0 }
 0x118   : > { %v907_v29 = vpack.c.bf16 %v887_v26, %v886_v25 }
 0x119   : > { %v906_v30 = vpack.c.bf16 %v885_v28, %v884_v27  ;;  %v2559_v31 = vpop.f32.mrb[24].mxu0 }
 0x11a   : > { %v842_v32 = vadd.f32 %v2559_v31, %v3037_v59  ;;  %v833_v33 = vpop.f32.mrb[25].mxu0 }
 0x11b   : > { %v834_v34 = vadd.f32 %v3037_v59, %v833_v33  ;;  %v2560_v35 = vpop.f32.mrb[26].mxu0  ;;  %2589 = vmatprep.mubr.msk.bf16.mxu1 %vm935_vm3, %v906_v30 }
 0x11c   : > { %v845_v36 = vadd.f32 %v2560_v35, %v3037_v59  ;;  %v836_v38 = vpop.f32.mrb[27].mxu0  ;;  %2590 = vmatmul.mubr.msk.bf16.gmra.mrb[24].mxu1 %vm935_vm3, %v907_v29  ;;  %v890_v41 = vmax.f32 %v842_v32, 0.0 }
 0x11d   : > { %v837_v39 = vadd.f32 %v3037_v59, %v836_v38  ;;  %v888_v43 = vmax.f32 %v834_v34, 0.0  ;;  %v2771_v59 = vld [vmem:[%s3432_s7] sm:$0xff]  }
 0x11e   : > { %v891_v42 = vmax.f32 %v845_v36, 0.0  ;;  %2641 = vmatprep.subr.bf16.mxu1 %v2771_v59 }
 0x11f   : > { %v889_v44 = vmax.f32 %v837_v39, 0.0  ;;  %2642 = vmatpush3.bf16.msra.mxu1 %v2771_v59 }
 0x120   : > { %v909_v45 = vpack.c.bf16 %v891_v42, %v890_v41  ;;  %2643 = vmatprep.subr.bf16.mxu1 %v2772_v47 }
 0x121   : > { %v908_v46 = vpack.c.bf16 %v889_v44, %v888_v43 }
 0x123   : > { %2593 = vmatprep.mubr.msk.bf16.mxu1 %vm935_vm3, %v908_v46  ;;  %2644 = vmatpush3.bf16.msra.mxu1 %v2772_v47 }
 0x124   : > { %2594 = vmatmul.mubr.msk.bf16.gmra.mrb[28].mxu1 %vm935_vm3, %v909_v45  ;;  %2645 = vmatprep.subr.bf16.mxu1 %v2773_v48 }
 0x125   : > { %2597 = vmatprep.mubr.msk.bf16.mxu1 %vm935_vm3, %v3056_v40  ;;  %v2775_v40 = vld [vmem:[%s3432_s7 + $0x20] sm:$0xff]  }
 0x127   : > { %2646 = vmatpush3.bf16.msra.mxu1 %v2773_v48 }
 0x12c   : > { %2598 = vmatmul.mubr.msk.bf16.gmra.mrb[32].mxu1 %vm935_vm3, %v3053_v37  ;;  %v2774_v37 = vld [vmem:[%s3432_s7 + $0x18] sm:$0xff]  }
 0x12d   : > { %2647 = vmatprep.subr.bf16.mxu1 %v2774_v37 }
 0x12e   : > { %2648 = vmatpush3.bf16.msra.mxu1 %v2774_v37 }
 0x12f   : > { %2649 = vmatprep.subr.bf16.mxu1 %v2775_v40 }
 0x132   : > { %2650 = vmatpush3.bf16.msra.mxu1 %v2775_v40 }
 0x133   : > { %2651 = vmatprep.subr.bf16.mxu1 %v2776_v49 }
 0x136   : > { %2652 = vmatpush3.bf16.msra.mxu1 %v2776_v49 }
 0x137   : > { %2653 = vmatprep.subr.bf16.mxu1 %v2777_v50 }
 0x13a   : > { %2654 = vmatpush3.bf16.msra.mxu1 %v2777_v50 }
 0x1c7   : > { %v2571_v52 = vpop.f32.mrb[4].mxu1 }
 0x1c8   : > { %v1027_v53 = vadd.f32 %v2571_v52, %v3117_v51  ;;  %v1018_v54 = vpop.f32.mrb[5].mxu1 }
 0x1c9   : > { %v1019_v55 = vadd.f32 %v3117_v51, %v1018_v54  ;;  %v2572_v56 = vpop.f32.mrb[6].mxu1 }
 0x1ca   : > { %v1030_v57 = vadd.f32 %v2572_v56, %v3117_v51  ;;  %v1021_v58 = vpop.f32.mrb[7].mxu1  ;;  %v1147_v61 = vmax.f32 %v1027_v53, 0.0 }
 0x1cb   : > { %v1022_v60 = vadd.f32 %v3117_v51, %v1021_v58  ;;  %v1145_v63 = vmax.f32 %v1019_v55, 0.0 }
 0x1cc   : > { %v1148_v62 = vmax.f32 %v1030_v57, 0.0 }
 0x1cd   : > { %v1146_v0 = vmax.f32 %v1022_v60, 0.0 }
 0x1ce   : > { %v1178_v1 = vpack.c.bf16 %v1148_v62, %v1147_v61 }
 0x1cf   : > { %v1177_v2 = vpack.c.bf16 %v1146_v0, %v1145_v63  ;;  %v2575_v3 = vpop.f32.mrb[8].mxu1 }
 0x1d0   : > { %v1043_v4 = vadd.f32 %v2575_v3, %v3117_v51  ;;  %v1034_v5 = vpop.f32.mrb[9].mxu1 }
 0x1d1   : > { %v1035_v6 = vadd.f32 %v3117_v51, %v1034_v5  ;;  %v2576_v7 = vpop.f32.mrb[10].mxu1  ;;  %2609 = vmatprep.mubr.msk.bf16.mxu0 %vm1232_vm4, %v1177_v2 }
 0x1d2   : > { %v1046_v8 = vadd.f32 %v2576_v7, %v3117_v51  ;;  %v1037_v9 = vpop.f32.mrb[11].mxu1  ;;  %2610 = vmatmul.mubr.msk.bf16.vlgmr.msra.gmra.mrb[28].mxu0 %vm1232_vm4, %v1178_v1  ;;  %v1151_v11 = vmax.f32 %v1043_v4, 0.0 }
 0x1d3   : > { %v1038_v10 = vadd.f32 %v3117_v51, %v1037_v9  ;;  %v1149_v13 = vmax.f32 %v1035_v6, 0.0 }
 0x1d4   : > { %v1152_v12 = vmax.f32 %v1046_v8, 0.0 }
 0x1d5   : > { %v1150_v14 = vmax.f32 %v1038_v10, 0.0 }
 0x1d6   : > { %v1180_v15 = vpack.c.bf16 %v1152_v12, %v1151_v11 }
 0x1d7   : > { %v1179_v16 = vpack.c.bf16 %v1150_v14, %v1149_v13  ;;  %v2579_v17 = vpop.f32.mrb[12].mxu1 }
 0x1d8   : > { %v1059_v18 = vadd.f32 %v2579_v17, %v3117_v51  ;;  %v1050_v19 = vpop.f32.mrb[13].mxu1 }
 0x1d9   : > { %v1051_v20 = vadd.f32 %v3117_v51, %v1050_v19  ;;  %v2580_v21 = vpop.f32.mrb[14].mxu1  ;;  %2613 = vmatprep.mubr.msk.bf16.mxu0 %vm1232_vm4, %v1179_v16 }
 0x1da   : > { %v1062_v22 = vadd.f32 %v2580_v21, %v3117_v51  ;;  %v1053_v23 = vpop.f32.mrb[15].mxu1  ;;  %2614 = vmatmul.mubr.msk.bf16.gmra.mrb[32].mxu0 %vm1232_vm4, %v1180_v15  ;;  %v1155_v25 = vmax.f32 %v1059_v18, 0.0 }
 0x1db   : > { %v1054_v24 = vadd.f32 %v3117_v51, %v1053_v23  ;;  %v1153_v27 = vmax.f32 %v1051_v20, 0.0 }
 0x1dc   : > { %v1156_v26 = vmax.f32 %v1062_v22, 0.0 }
 0x1dd   : > { %v1154_v28 = vmax.f32 %v1054_v24, 0.0 }
 0x1de   : > { %v1182_v29 = vpack.c.bf16 %v1156_v26, %v1155_v25 }
 0x1df   : > { %v1181_v30 = vpack.c.bf16 %v1154_v28, %v1153_v27  ;;  %v2583_v31 = vpop.f32.mrb[16].mxu1 }
 0x1e0   : > { %v1075_v32 = vadd.f32 %v2583_v31, %v3117_v51  ;;  %v1066_v33 = vpop.f32.mrb[17].mxu1 }
 0x1e1   : > { %v1067_v34 = vadd.f32 %v3117_v51, %v1066_v33  ;;  %v2584_v35 = vpop.f32.mrb[18].mxu1  ;;  %2617 = vmatprep.mubr.msk.bf16.mxu0 %vm1232_vm4, %v1181_v30 }
 0x1e2   : > { %v1078_v36 = vadd.f32 %v2584_v35, %v3117_v51  ;;  %v1069_v38 = vpop.f32.mrb[19].mxu1  ;;  %2618 = vmatmul.mubr.msk.bf16.gmra.mrb[36].mxu0 %vm1232_vm4, %v1182_v29  ;;  %v1159_v41 = vmax.f32 %v1075_v32, 0.0 }
 0x1e3   : > { %v1070_v39 = vadd.f32 %v3117_v51, %v1069_v38  ;;  %v1157_v43 = vmax.f32 %v1067_v34, 0.0 }
 0x1e4   : > { %v1160_v42 = vmax.f32 %v1078_v36, 0.0 }
 0x1e5   : > { %v1158_v44 = vmax.f32 %v1070_v39, 0.0  ;;  %v2778_v39 = vld [vmem:[%s3432_s7 + $0x38] sm:$0xff]  }
 0x1e6   : > { %v1184_v45 = vpack.c.bf16 %v1160_v42, %v1159_v41  ;;  %2655 = vmatprep.subr.bf16.mxu1 %v2778_v39 }
 0x1e7   : > { %v1183_v46 = vpack.c.bf16 %v1158_v44, %v1157_v43  ;;  %v2587_v59 = vpop.f32.mrb[20].mxu1  ;;  %2656 = vmatpush3.bf16.msra.mxu1 %v2778_v39 }
 0x1e8   : > { %v1091_v47 = vadd.f32 %v2587_v59, %v3117_v51  ;;  %v1082_v48 = vpop.f32.mrb[21].mxu1 }
 0x1e9   : > { %v1083_v37 = vadd.f32 %v3117_v51, %v1082_v48  ;;  %v2588_v40 = vpop.f32.mrb[22].mxu1  ;;  %2621 = vmatprep.mubr.msk.bf16.mxu0 %vm1232_vm4, %v1183_v46 }
 0x1ea   : > { %v1094_v49 = vadd.f32 %v2588_v40, %v3117_v51  ;;  %v1085_v50 = vpop.f32.mrb[23].mxu1  ;;  %2622 = vmatmul.mubr.msk.bf16.gmra.mrb[40].mxu0 %vm1232_vm4, %v1184_v45  ;;  %v1163_v53 = vmax.f32 %v1091_v47, 0.0 }
 0x1eb   : > { %v1086_v52 = vadd.f32 %v3117_v51, %v1085_v50  ;;  %v1161_v55 = vmax.f32 %v1083_v37, 0.0 }
 0x1ec   : > { %v1164_v54 = vmax.f32 %v1094_v49, 0.0 }
 0x1ed   : > { %v1162_v56 = vmax.f32 %v1086_v52, 0.0 }
 0x1ee   : > { %v1186_v57 = vpack.c.bf16 %v1164_v54, %v1163_v53 }
 0x1ef   : > { %v1185_v58 = vpack.c.bf16 %v1162_v56, %v1161_v55  ;;  %v2591_v60 = vpop.f32.mrb[24].mxu1 }
 0x1f0   : > { %v1107_v61 = vadd.f32 %v2591_v60, %v3117_v51  ;;  %v1098_v62 = vpop.f32.mrb[25].mxu1 }
 0x1f1   : > { %v1099_v63 = vadd.f32 %v3117_v51, %v1098_v62  ;;  %v2592_v0 = vpop.f32.mrb[26].mxu1  ;;  %2625 = vmatprep.mubr.msk.bf16.mxu0 %vm1232_vm4, %v1185_v58 }
 0x1f2   : > { %v1110_v1 = vadd.f32 %v2592_v0, %v3117_v51  ;;  %v1101_v2 = vpop.f32.mrb[27].mxu1  ;;  %2626 = vmatmul.mubr.msk.bf16.gmra.mrb[44].mxu0 %vm1232_vm4, %v1186_v57  ;;  %v1167_v4 = vmax.f32 %v1107_v61, 0.0 }
 0x1f3   : > { %v1102_v3 = vadd.f32 %v3117_v51, %v1101_v2  ;;  %v1165_v6 = vmax.f32 %v1099_v63, 0.0 }
 0x1f4   : > { %v1168_v5 = vmax.f32 %v1110_v1, 0.0 }
 0x1f5   : > { %v1166_v7 = vmax.f32 %v1102_v3, 0.0 }
 0x1f6   : > { %v1188_v8 = vpack.c.bf16 %v1168_v5, %v1167_v4 }
 0x1f7   : > { %v1187_v9 = vpack.c.bf16 %v1166_v7, %v1165_v6  ;;  %v2595_v10 = vpop.f32.mrb[28].mxu1 }
 0x1f8   : > { %v1123_v11 = vadd.f32 %v2595_v10, %v3117_v51  ;;  %v1114_v12 = vpop.f32.mrb[29].mxu1 }
 0x1f9   : > { %v1115_v13 = vadd.f32 %v3117_v51, %v1114_v12  ;;  %v2596_v14 = vpop.f32.mrb[30].mxu1  ;;  %2629 = vmatprep.mubr.msk.bf16.mxu0 %vm1232_vm4, %v1187_v9 }
 0x1fa   : > { %v1126_v15 = vadd.f32 %v2596_v14, %v3117_v51  ;;  %v1117_v16 = vpop.f32.mrb[31].mxu1  ;;  %2630 = vmatmul.mubr.msk.bf16.gmra.mrb[48].mxu0 %vm1232_vm4, %v1188_v8  ;;  %v1171_v18 = vmax.f32 %v1123_v11, 0.0 }
 0x1fb   : > { %v1118_v17 = vadd.f32 %v3117_v51, %v1117_v16  ;;  %v1169_v20 = vmax.f32 %v1115_v13, 0.0 }
 0x1fc   : > { %v1172_v19 = vmax.f32 %v1126_v15, 0.0 }
 0x1fd   : > { %v1170_v21 = vmax.f32 %v1118_v17, 0.0 }
 0x1fe   : > { %v1190_v22 = vpack.c.bf16 %v1172_v19, %v1171_v18 }
 0x1ff   : > { %v1189_v23 = vpack.c.bf16 %v1170_v21, %v1169_v20  ;;  %v2599_v24 = vpop.f32.mrb[32].mxu1 }
 0x200   : > { %v1139_v25 = vadd.f32 %v2599_v24, %v3117_v51  ;;  %v1130_v26 = vpop.f32.mrb[33].mxu1 }
 0x201   : > { %v1131_v27 = vadd.f32 %v3117_v51, %v1130_v26  ;;  %v2600_v28 = vpop.f32.mrb[34].mxu1  ;;  %2633 = vmatprep.mubr.msk.bf16.mxu0 %vm1232_vm4, %v1189_v23 }
 0x202   : > { %v1142_v29 = vadd.f32 %v2600_v28, %v3117_v51  ;;  %v1133_v30 = vpop.f32.mrb[35].mxu1  ;;  %2634 = vmatmul.mubr.msk.bf16.gmra.mrb[52].mxu0 %vm1232_vm4, %v1190_v22  ;;  %v1175_v32 = vmax.f32 %v1139_v25, 0.0 }
 0x203   : > { %v1134_v31 = vadd.f32 %v3117_v51, %v1133_v30  ;;  %v1173_v34 = vmax.f32 %v1131_v27, 0.0  ;;  %v3173_v51 = vld [vmem:[%s3431_s6] ss:$0 sm:$0xff] }
 0x204   : > { %v1176_v33 = vmax.f32 %v1142_v29, 0.0 }
 0x205   : > { %v1174_v35 = vmax.f32 %v1134_v31, 0.0 }
 0x206   : > { %v1192_v36 = vpack.c.bf16 %v1176_v33, %v1175_v32 }
 0x207   : > { %v1191_v38 = vpack.c.bf16 %v1174_v35, %v1173_v34 }
 0x209   : > { %2637 = vmatprep.mubr.msk.bf16.mxu0 %vm1232_vm4, %v1191_v38 }
 0x20a   : > { %2638 = vmatmul.mubr.msk.bf16.gmra.mrb[56].mxu0 %vm1232_vm4, %v1192_v36 }
 0x2a5   : > { %v2611_v41 = vpop.f32.mrb[28].mxu0 }
 0x2a6   : > { %v1324_v42 = vadd.f32 %v2611_v41, %v3173_v51  ;;  %v1315_v43 = vpop.f32.mrb[29].mxu0 }
 0x2a7   : > { %v1316_v44 = vadd.f32 %v3173_v51, %v1315_v43  ;;  %v2612_v45 = vpop.f32.mrb[30].mxu0 }
 0x2a8   : > { %v1327_v46 = vadd.f32 %v2612_v45, %v3173_v51  ;;  %v1318_v59 = vpop.f32.mrb[31].mxu0  ;;  %v1444_v48 = vmax.f32 %v1324_v42, 0.0 }
 0x2a9   : > { %v1319_v47 = vadd.f32 %v3173_v51, %v1318_v59  ;;  %v1442_v40 = vmax.f32 %v1316_v44, 0.0 }
 0x2aa   : > { %v1445_v37 = vmax.f32 %v1327_v46, 0.0 }
 0x2ab   : > { %v1443_v49 = vmax.f32 %v1319_v47, 0.0 }
 0x2ac   : > { %v1475_v50 = vpack.c.bf16 %v1445_v37, %v1444_v48 }
 0x2ad   : > { %v1474_v52 = vpack.c.bf16 %v1443_v49, %v1442_v40  ;;  %v2615_v53 = vpop.f32.mrb[32].mxu0 }
 0x2ae   : > { %v1340_v54 = vadd.f32 %v2615_v53, %v3173_v51  ;;  %v1331_v55 = vpop.f32.mrb[33].mxu0 }
 0x2af   : > { %v1332_v56 = vadd.f32 %v3173_v51, %v1331_v55  ;;  %v2616_v57 = vpop.f32.mrb[34].mxu0  ;;  %2657 = vmatprep.mubr.bf16.mxu1 %v1474_v52 }
 0x2b0   : > { %v1343_v58 = vadd.f32 %v2616_v57, %v3173_v51  ;;  %v1334_v60 = vpop.f32.mrb[35].mxu0  ;;  %2658 = vmatmul.mubr.bf16.vlgmr.msra.gmra.mrb[36].mxu1 %v1475_v50  ;;  %v1448_v62 = vmax.f32 %v1340_v54, 0.0 }
 0x2b1   : > { %v1335_v61 = vadd.f32 %v3173_v51, %v1334_v60  ;;  %v1446_v0 = vmax.f32 %v1332_v56, 0.0 }
 0x2b2   : > { %v1449_v63 = vmax.f32 %v1343_v58, 0.0 }
 0x2b3   : > { %v1447_v1 = vmax.f32 %v1335_v61, 0.0 }
 0x2b4   : > { %v1477_v2 = vpack.c.bf16 %v1449_v63, %v1448_v62 }
 0x2b5   : > { %v1476_v3 = vpack.c.bf16 %v1447_v1, %v1446_v0  ;;  %v2619_v4 = vpop.f32.mrb[36].mxu0 }
 0x2b6   : > { %v1356_v5 = vadd.f32 %v2619_v4, %v3173_v51  ;;  %v1347_v6 = vpop.f32.mrb[37].mxu0 }
 0x2b7   : > { %v1348_v7 = vadd.f32 %v3173_v51, %v1347_v6  ;;  %v2620_v8 = vpop.f32.mrb[38].mxu0  ;;  %2661 = vmatprep.mubr.bf16.mxu1 %v1476_v3 }
 0x2b8   : > { %v1359_v9 = vadd.f32 %v2620_v8, %v3173_v51  ;;  %v1350_v10 = vpop.f32.mrb[39].mxu0  ;;  %2662 = vmatmul.mubr.bf16.gmra.mrb[40].mxu1 %v1477_v2  ;;  %v1452_v12 = vmax.f32 %v1356_v5, 0.0 }
 0x2b9   : > { %v1351_v11 = vadd.f32 %v3173_v51, %v1350_v10  ;;  %v1450_v14 = vmax.f32 %v1348_v7, 0.0 }
 0x2ba   : > { %v1453_v13 = vmax.f32 %v1359_v9, 0.0 }
 0x2bb   : > { %v1451_v15 = vmax.f32 %v1351_v11, 0.0 }
 0x2bc   : > { %v1479_v16 = vpack.c.bf16 %v1453_v13, %v1452_v12 }
 0x2bd   : > { %v1478_v17 = vpack.c.bf16 %v1451_v15, %v1450_v14  ;;  %v2623_v18 = vpop.f32.mrb[40].mxu0 }
 0x2be   : > { %v1372_v19 = vadd.f32 %v2623_v18, %v3173_v51  ;;  %v1363_v20 = vpop.f32.mrb[41].mxu0 }
 0x2bf   : > { %v1364_v21 = vadd.f32 %v3173_v51, %v1363_v20  ;;  %v2624_v22 = vpop.f32.mrb[42].mxu0  ;;  %2665 = vmatprep.mubr.bf16.mxu1 %v1478_v17 }
 0x2c0   : > { %v1375_v23 = vadd.f32 %v2624_v22, %v3173_v51  ;;  %v1366_v24 = vpop.f32.mrb[43].mxu0  ;;  %2666 = vmatmul.mubr.bf16.gmra.mrb[44].mxu1 %v1479_v16  ;;  %v1456_v26 = vmax.f32 %v1372_v19, 0.0 }
 0x2c1   : > { %v1367_v25 = vadd.f32 %v3173_v51, %v1366_v24  ;;  %v1454_v28 = vmax.f32 %v1364_v21, 0.0 }
 0x2c2   : > { %v1457_v27 = vmax.f32 %v1375_v23, 0.0 }
 0x2c3   : > { %v1455_v29 = vmax.f32 %v1367_v25, 0.0  ;;  %v2779_v25 = vld [vmem:[%s3434_s9] sm:$0xff]  }
 0x2c4   : > { %v1481_v30 = vpack.c.bf16 %v1457_v27, %v1456_v26  ;;  %v2844_v26 = vmov 0.0   ;;  %v2845_v27 = vmov -inf  }
 0x2c5   : > { %v1480_v31 = vpack.c.bf16 %v1455_v29, %v1454_v28  ;;  %v2627_v32 = vpop.f32.mrb[44].mxu0  ;;  %2689 = vmatprep.subr.bf16.mxu0 %v2844_v26  ;;  %2701 = vmatprep.subr.bf16.mxu1 %v2844_v26  ;;  %590 = vst.msk [vmem:[#allocation2] sm:$0x1] %vm589_vm5, %v2845_v27  ;;  %v2781_v28 = vld [vmem:[%s3434_s9 + $0x10] sm:$0xff]   ;;  %v2782_v29 = vld [vmem:[%s3434_s9 + $0x18] sm:$0xff]  }
 0x2c6   : > { %v1388_v33 = vadd.f32 %v2627_v32, %v3173_v51  ;;  %v1379_v34 = vpop.f32.mrb[45].mxu0  ;;  %2690 = vmatpush3.bf16.msra.mxu0 %v2779_v25  ;;  %2697 = vmatprep.mubr.msk.bf16.mxu0 %vm2846_vm6, %v2844_v26  ;;  %v2785_v32 = vld [vmem:[%s3436_s11 + $0x10] sm:$0xff]  }
 0x2c7   : > { %v1380_v35 = vadd.f32 %v3173_v51, %v1379_v34  ;;  %v2628_v36 = vpop.f32.mrb[46].mxu0  ;;  %2669 = vmatprep.mubr.bf16.mxu1 %v1480_v31  ;;  %2691 = vmatprep.subr.bf16.mxu0 %v2844_v26  ;;  %v2784_v31 = vld [vmem:[%s3436_s11 + $0x8] sm:$0xff]   ;;  %v2787_v34 = vld [vmem:[%s3436_s11 + $0x20] sm:$0xff]  }
 0x2c8   : > { %v1391_v38 = vadd.f32 %v2628_v36, %v3173_v51  ;;  %v1382_v39 = vpop.f32.mrb[47].mxu0  ;;  %2670 = vmatmul.mubr.bf16.gmra.mrb[48].mxu1 %v1481_v30  ;;  %v1460_v42 = vmax.f32 %v1388_v33, 0.0  ;;  %v2783_v30 = vld [vmem:[%s3436_s11] sm:$0xff]   ;;  %v2786_v33 = vld [vmem:[%s3436_s11 + $0x18] sm:$0xff]   ;;  %v2789_v36 = vld [vmem:[%s3436_s11 + $0x30] sm:$0xff]  }
 0x2c9   : > { %v1383_v41 = vadd.f32 %v3173_v51, %v1382_v39  ;;  %v1458_v44 = vmax.f32 %v1380_v35, 0.0  ;;  %2702 = vmatpush3.bf16.msra.mxu1 %v2783_v30  ;;  %v2788_v35 = vld [vmem:[%s3436_s11 + $0x28] sm:$0xff]  }
 0x2ca   : > { %v1461_v43 = vmax.f32 %v1391_v38, 0.0  ;;  %2703 = vmatprep.subr.bf16.mxu1 %v2844_v26  ;;  %v2790_v38 = vld [vmem:[%s3436_s11 + $0x38] sm:$0xff]  }
 0x2cb   : > { %v1459_v45 = vmax.f32 %v1383_v41, 0.0 }
 0x2cc   : > { %v1483_v46 = vpack.c.bf16 %v1461_v43, %v1460_v42 }
 0x2cd   : > { %v1482_v59 = vpack.c.bf16 %v1459_v45, %v1458_v44  ;;  %v2631_v47 = vpop.f32.mrb[48].mxu0  ;;  %2704 = vmatpush3.bf16.msra.mxu1 %v2784_v31  ;;  %v3264_v44 = vld [vmem:[%s3433_s8] ss:$0 sm:$0xff] }
 0x2ce   : > { %v1404_v48 = vadd.f32 %v2631_v47, %v3173_v51  ;;  %v1395_v37 = vpop.f32.mrb[49].mxu0  ;;  %2705 = vmatprep.subr.bf16.mxu1 %v2844_v26 }
 0x2cf   : > { %v1396_v40 = vadd.f32 %v3173_v51, %v1395_v37  ;;  %v2632_v49 = vpop.f32.mrb[50].mxu0  ;;  %2673 = vmatprep.mubr.bf16.mxu1 %v1482_v59 }
 0x2d0   : > { %v1407_v50 = vadd.f32 %v2632_v49, %v3173_v51  ;;  %v1398_v52 = vpop.f32.mrb[51].mxu0  ;;  %2674 = vmatmul.mubr.bf16.gmra.mrb[52].mxu1 %v1483_v46  ;;  %v1464_v54 = vmax.f32 %v1404_v48, 0.0 }
 0x2d1   : > { %v1399_v53 = vadd.f32 %v3173_v51, %v1398_v52  ;;  %v1462_v56 = vmax.f32 %v1396_v40, 0.0  ;;  %2706 = vmatpush3.bf16.msra.mxu1 %v2785_v32 }
 0x2d2   : > { %v1465_v55 = vmax.f32 %v1407_v50, 0.0  ;;  %2707 = vmatprep.subr.bf16.mxu1 %v2844_v26 }
 0x2d3   : > { %v1463_v57 = vmax.f32 %v1399_v53, 0.0 }
 0x2d4   : > { %v1485_v58 = vpack.c.bf16 %v1465_v55, %v1464_v54 }
 0x2d5   : > { %v1484_v60 = vpack.c.bf16 %v1463_v57, %v1462_v56  ;;  %v2635_v61 = vpop.f32.mrb[52].mxu0  ;;  %2708 = vmatpush3.bf16.msra.mxu1 %v2786_v33 }
 0x2d6   : > { %v1420_v62 = vadd.f32 %v2635_v61, %v3173_v51  ;;  %v1411_v63 = vpop.f32.mrb[53].mxu0  ;;  %2709 = vmatprep.subr.bf16.mxu1 %v2844_v26 }
 0x2d7   : > { %v1412_v0 = vadd.f32 %v3173_v51, %v1411_v63  ;;  %v2636_v1 = vpop.f32.mrb[54].mxu0  ;;  %2677 = vmatprep.mubr.bf16.mxu1 %v1484_v60 }
 0x2d8   : > { %v1423_v2 = vadd.f32 %v2636_v1, %v3173_v51  ;;  %v1414_v3 = vpop.f32.mrb[55].mxu0  ;;  %2678 = vmatmul.mubr.bf16.gmra.mrb[56].mxu1 %v1485_v58  ;;  %v1468_v5 = vmax.f32 %v1420_v62, 0.0 }
 0x2d9   : > { %v1415_v4 = vadd.f32 %v3173_v51, %v1414_v3  ;;  %v1466_v7 = vmax.f32 %v1412_v0, 0.0  ;;  %2710 = vmatpush3.bf16.msra.mxu1 %v2787_v34 }
 0x2da   : > { %v1469_v6 = vmax.f32 %v1423_v2, 0.0  ;;  %2711 = vmatprep.subr.bf16.mxu1 %v2844_v26 }
 0x2db   : > { %v1467_v8 = vmax.f32 %v1415_v4, 0.0 }
 0x2dc   : > { %v1487_v9 = vpack.c.bf16 %v1469_v6, %v1468_v5 }
 0x2dd   : > { %v1486_v10 = vpack.c.bf16 %v1467_v8, %v1466_v7  ;;  %v2639_v11 = vpop.f32.mrb[56].mxu0  ;;  %2712 = vmatpush3.bf16.msra.mxu1 %v2788_v35 }
 0x2de   : > { %v1436_v12 = vadd.f32 %v2639_v11, %v3173_v51  ;;  %v1427_v13 = vpop.f32.mrb[57].mxu0  ;;  %2713 = vmatprep.subr.bf16.mxu1 %v2844_v26 }
 0x2df   : > { %v1428_v14 = vadd.f32 %v3173_v51, %v1427_v13  ;;  %v2640_v15 = vpop.f32.mrb[58].mxu0  ;;  %2681 = vmatprep.mubr.bf16.mxu1 %v1486_v10 }
 0x2e0   : > { %v1439_v16 = vadd.f32 %v2640_v15, %v3173_v51  ;;  %v1430_v17 = vpop.f32.mrb[59].mxu0  ;;  %2682 = vmatmul.mubr.bf16.gmra.mrb[60].mxu1 %v1487_v9  ;;  %v1472_v19 = vmax.f32 %v1436_v12, 0.0 }
 0x2e1   : > { %v1431_v18 = vadd.f32 %v3173_v51, %v1430_v17  ;;  %v1470_v21 = vmax.f32 %v1428_v14, 0.0  ;;  %v2780_v51 = vld [vmem:[%s3434_s9 + $0x8] sm:$0xff]   ;;  %2714 = vmatpush3.bf16.msra.mxu1 %v2789_v36 }
 0x2e2   : > { %v1473_v20 = vmax.f32 %v1439_v16, 0.0  ;;  %2692 = vmatpush3.bf16.msra.mxu0 %v2780_v51  ;;  %2715 = vmatprep.subr.bf16.mxu1 %v2844_v26 }
 0x2e3   : > { %v1471_v22 = vmax.f32 %v1431_v18, 0.0  ;;  %2693 = vmatprep.subr.bf16.mxu0 %v2844_v26 }
 0x2e4   : > { %v1489_v23 = vpack.c.bf16 %v1473_v20, %v1472_v19 }
 0x2e5   : > { %v1488_v24 = vpack.c.bf16 %v1471_v22, %v1470_v21  ;;  %2716 = vmatpush3.bf16.msra.mxu1 %v2790_v38 }
 0x2e6   : > { %2694 = vmatpush3.bf16.msra.mxu0 %v2781_v28  ;;  %2721 = vmatprep.subr.bf16.mxu1 %v2844_v26 }
 0x2e7   : > { %2685 = vmatprep.mubr.bf16.mxu1 %v1488_v24  ;;  %2695 = vmatprep.subr.bf16.mxu0 %v2844_v26 }
 0x2e8   : > { %2686 = vmatmul.mubr.bf16.gmra.mrb[64].mxu1 %v1489_v23 }
 0x2e9   : > { %2717 = vmatprep.mubr.msk.bf16.mxu1 %vm2846_vm6, %v2844_v26 }
 0x2ea   : > { %2696 = vmatpush3.bf16.msra.mxu0 %v2782_v29 }
 0x383   : > { %v2659_v39 = vpop.f32.mrb[36].mxu1 }
 0x384   : > { %v1595_v41 = vpop.f32.mrb[37].mxu1  ;;  %v1604_v45 = vadd.f32 %v2659_v39, %v3264_v44 }
 0x385   : > { %v2660_v42 = vpop.f32.mrb[38].mxu1  ;;  %v1596_v46 = vadd.f32 %v3264_v44, %v1595_v41 }
 0x386   : > { %v1598_v43 = vpop.f32.mrb[39].mxu1  ;;  %v1607_v47 = vadd.f32 %v2660_v42, %v3264_v44  ;;  %v1725_v52 = vsel %vm1232_vm4, %v1604_v45, -inf }
 0x387   : > { %v1599_v40 = vadd.f32 %v3264_v44, %v1598_v43  ;;  %v1723_v56 = vsel %vm1232_vm4, %v1596_v46, -inf }
 0x388   : > { %v1726_v61 = vsel %vm1232_vm4, %v1607_v47, -inf }
 0x389   : > { %v1724_v0 = vsel %vm1232_vm4, %v1599_v40, -inf }
 0x38b   : > { %v2663_v59 = vpop.f32.mrb[40].mxu1 }
 0x38c   : > { %v1620_v48 = vadd.f32 %v2663_v59, %v3264_v44  ;;  %v1611_v37 = vpop.f32.mrb[41].mxu1 }
 0x38d   : > { %v1612_v49 = vadd.f32 %v3264_v44, %v1611_v37  ;;  %v2664_v50 = vpop.f32.mrb[42].mxu1 }
 0x38e   : > { %v1731_v53 = vsel %vm1232_vm4, %v1620_v48, -inf  ;;  %v1623_v54 = vadd.f32 %v2664_v50, %v3264_v44  ;;  %v1614_v55 = vpop.f32.mrb[43].mxu1 }
 0x38f   : > { %v1732_v57 = vmax.f32 %v1725_v52, %v1731_v53  ;;  %v1727_v58 = vsel %vm1232_vm4, %v1612_v49, -inf  ;;  %v1615_v60 = vadd.f32 %v3264_v44, %v1614_v55 }
 0x390   : > { %v1728_v62 = vmax.f32 %v1723_v56, %v1727_v58  ;;  %v1733_v63 = vsel %vm1232_vm4, %v1623_v54, -inf }
 0x391   : > { %v1734_v1 = vmax.f32 %v1726_v61, %v1733_v63  ;;  %v1729_v2 = vsel %vm1232_vm4, %v1615_v60, -inf }
 0x392   : > { %v1730_v3 = vmax.f32 %v1724_v0, %v1729_v2 }
 0x393   : > { %v2667_v4 = vpop.f32.mrb[44].mxu1 }
 0x394   : > { %v1636_v5 = vadd.f32 %v2667_v4, %v3264_v44  ;;  %v1627_v6 = vpop.f32.mrb[45].mxu1 }
 0x395   : > { %v1628_v7 = vadd.f32 %v3264_v44, %v1627_v6  ;;  %v2668_v8 = vpop.f32.mrb[46].mxu1 }
 0x396   : > { %v1739_v9 = vsel %vm1232_vm4, %v1636_v5, -inf  ;;  %v1639_v10 = vadd.f32 %v2668_v8, %v3264_v44  ;;  %v1630_v11 = vpop.f32.mrb[47].mxu1 }
 0x397   : > { %v1740_v12 = vmax.f32 %v1732_v57, %v1739_v9  ;;  %v1735_v13 = vsel %vm1232_vm4, %v1628_v7, -inf  ;;  %v1631_v14 = vadd.f32 %v3264_v44, %v1630_v11 }
 0x398   : > { %v1736_v15 = vmax.f32 %v1728_v62, %v1735_v13  ;;  %v1741_v16 = vsel %vm1232_vm4, %v1639_v10, -inf }
 0x399   : > { %v1742_v17 = vmax.f32 %v1734_v1, %v1741_v16  ;;  %v1737_v18 = vsel %vm1232_vm4, %v1631_v14, -inf }
 0x39a   : > { %v1738_v19 = vmax.f32 %v1730_v3, %v1737_v18 }
 0x39b   : > { %v2671_v20 = vpop.f32.mrb[48].mxu1 }
 0x39c   : > { %v1652_v21 = vadd.f32 %v2671_v20, %v3264_v44  ;;  %v1643_v22 = vpop.f32.mrb[49].mxu1 }
 0x39d   : > { %v1644_v23 = vadd.f32 %v3264_v44, %v1643_v22  ;;  %v2672_v24 = vpop.f32.mrb[50].mxu1 }
 0x39e   : > { %v1747_v25 = vsel %vm1232_vm4, %v1652_v21, -inf  ;;  %v1655_v51 = vadd.f32 %v2672_v24, %v3264_v44  ;;  %v1646_v27 = vpop.f32.mrb[51].mxu1 }
 0x39f   : > { %v1748_v28 = vmax.f32 %v1740_v12, %v1747_v25  ;;  %v1743_v29 = vsel %vm1232_vm4, %v1644_v23, -inf  ;;  %v1647_v30 = vadd.f32 %v3264_v44, %v1646_v27 }
 0x3a0   : > { %v1744_v31 = vmax.f32 %v1736_v15, %v1743_v29  ;;  %v1749_v32 = vsel %vm1232_vm4, %v1655_v51, -inf }
 0x3a1   : > { %v1750_v33 = vmax.f32 %v1742_v17, %v1749_v32  ;;  %v1745_v34 = vsel %vm1232_vm4, %v1647_v30, -inf }
 0x3a2   : > { %v1746_v35 = vmax.f32 %v1738_v19, %v1745_v34 }
 0x3a3   : > { %v2675_v36 = vpop.f32.mrb[52].mxu1 }
 0x3a4   : > { %v1668_v38 = vadd.f32 %v2675_v36, %v3264_v44  ;;  %v1659_v39 = vpop.f32.mrb[53].mxu1 }
 0x3a5   : > { %v1660_v41 = vadd.f32 %v3264_v44, %v1659_v39  ;;  %v2676_v42 = vpop.f32.mrb[54].mxu1 }
 0x3a6   : > { %v1755_v43 = vsel %vm1232_vm4, %v1668_v38, -inf  ;;  %v1671_v45 = vadd.f32 %v2676_v42, %v3264_v44  ;;  %v1662_v46 = vpop.f32.mrb[55].mxu1 }
 0x3a7   : > { %v1756_v59 = vmax.f32 %v1748_v28, %v1755_v43  ;;  %v1751_v47 = vsel %vm1232_vm4, %v1660_v41, -inf  ;;  %v1663_v48 = vadd.f32 %v3264_v44, %v1662_v46 }
 0x3a8   : > { %v1752_v37 = vmax.f32 %v1744_v31, %v1751_v47  ;;  %v1757_v40 = vsel %vm1232_vm4, %v1671_v45, -inf }
 0x3a9   : > { %v1758_v49 = vmax.f32 %v1750_v33, %v1757_v40  ;;  %v1753_v50 = vsel %vm1232_vm4, %v1663_v48, -inf  ;;  %v1722_v48 = vld [vmem:[#allocation2] sm:$0x1] }
 0x3aa   : > { %v1754_v52 = vmax.f32 %v1746_v35, %v1753_v50  ;;  %v2795_v50 = vld [vmem:[%s3438_s13] ss:$8 sps:$4 sm:$0xff]  }
 0x3ab   : > { %v2679_v53 = vpop.f32.mrb[56].mxu1 }
 0x3ac   : > { %v1684_v54 = vadd.f32 %v2679_v53, %v3264_v44  ;;  %v1675_v55 = vpop.f32.mrb[57].mxu1  ;;  %v2800_v53 = vld [vmem:[%s3438_s13 + $0x14] ss:$8 sps:$4 sm:$0xff]  }
 0x3ad   : > { %v1676_v56 = vadd.f32 %v3264_v44, %v1675_v55  ;;  %v2680_v57 = vpop.f32.mrb[58].mxu1  ;;  %v2803_v55 = vld [vmem:[%s3438_s13 + $0x24] ss:$8 sps:$4 sm:$0xff]  }
 0x3ae   : > { %v1763_v58 = vsel %vm1232_vm4, %v1684_v54, -inf  ;;  %v1687_v60 = vadd.f32 %v2680_v57, %v3264_v44  ;;  %v1678_v61 = vpop.f32.mrb[59].mxu1  ;;  %v2798_v54 = vld [vmem:[%s3438_s13 + $0x10] ss:$8 sps:$4 sm:$0xff]   ;;  %v2806_v57 = vld [vmem:[%s3438_s13 + $0x34] ss:$8 sps:$4 sm:$0xff]  }
 0x3af   : > { %v1764_v62 = vmax.f32 %v1756_v59, %v1763_v58  ;;  %v1759_v63 = vsel %vm1232_vm4, %v1676_v56, -inf  ;;  %v1679_v0 = vadd.f32 %v3264_v44, %v1678_v61  ;;  %v2801_v56 = vld [vmem:[%s3438_s13 + $0x20] ss:$8 sps:$4 sm:$0xff]   ;;  %v2804_v58 = vld [vmem:[%s3438_s13 + $0x30] ss:$8 sps:$4 sm:$0xff]  }
 0x3b0   : > { %v1760_v1 = vmax.f32 %v1752_v37, %v1759_v63  ;;  %v1765_v2 = vsel %vm1232_vm4, %v1687_v60, -inf  ;;  %v2809_v60 = vld [vmem:[%s3438_s13 + $0x44] ss:$8 sps:$4 sm:$0xff]   ;;  %v2807_v61 = vld [vmem:[%s3438_s13 + $0x40] ss:$8 sps:$4 sm:$0xff]  }
 0x3b1   : > { %v1766_v3 = vmax.f32 %v1758_v49, %v1765_v2  ;;  %v1761_v4 = vsel %vm1232_vm4, %v1679_v0, -inf  ;;  %v2810_v63 = vld [vmem:[%s3438_s13 + $0x50] ss:$8 sps:$4 sm:$0xff]   ;;  %v2815_v0 = vld [vmem:[%s3438_s13 + $0x64] ss:$8 sps:$4 sm:$0xff]  }
 0x3b2   : > { %v1762_v5 = vmax.f32 %v1754_v52, %v1761_v4  ;;  %v2797_v52 = vld [vmem:[%s3438_s13 + $0x4] ss:$8 sps:$4 sm:$0xff]   ;;  %v1808_v2 = vld [vmem:[%s3435_s10] sm:$0x1] }
 0x3b3   : > { %v2683_v6 = vpop.f32.mrb[60].mxu1  ;;  %2093 = vmatprep.subr.bf16.mxu0 %v2797_v52 }
 0x3b4   : > { %v1700_v7 = vadd.f32 %v2683_v6, %v3264_v44  ;;  %v1691_v8 = vpop.f32.mrb[61].mxu1 }
 0x3b5   : > { %v1692_v9 = vadd.f32 %v3264_v44, %v1691_v8  ;;  %v2684_v10 = vpop.f32.mrb[62].mxu1 }
 0x3b6   : > { %v1771_v11 = vsel %vm1232_vm4, %v1700_v7, -inf  ;;  %v1703_v12 = vadd.f32 %v2684_v10, %v3264_v44  ;;  %v1694_v13 = vpop.f32.mrb[63].mxu1 }
 0x3b7   : > { %v1772_v14 = vmax.f32 %v1764_v62, %v1771_v11  ;;  %v1767_v15 = vsel %vm1232_vm4, %v1692_v9, -inf  ;;  %v1695_v16 = vadd.f32 %v3264_v44, %v1694_v13  ;;  %v2812_v62 = vld [vmem:[%s3438_s13 + $0x54] ss:$8 sps:$4 sm:$0xff]   ;;  %v2791_v9 = vld [vmem:[%s3440_s15] sm:$0xff]   ;;  %v2792_v11 = vld [vmem:[%s3440_s15 + $0x8] sm:$0xff]  }
 0x3b8   : > { %v1768_v17 = vmax.f32 %v1760_v1, %v1767_v15  ;;  %v1773_v18 = vsel %vm1232_vm4, %v1703_v12, -inf  ;;  %v2813_v1 = vld [vmem:[%s3438_s13 + $0x60] ss:$8 sps:$4 sm:$0xff]   ;;  %v2793_v12 = vld [vmem:[%s3440_s15 + $0x10] sm:$0xff]   ;;  %v2794_v13 = vld [vmem:[%s3440_s15 + $0x18] sm:$0xff]  }
 0x3b9   : > { %v1774_v19 = vmax.f32 %v1766_v3, %v1773_v18  ;;  %v1769_v20 = vsel %vm1232_vm4, %v1695_v16, -inf  ;;  %v2816_v15 = vld [vmem:[%s3438_s13 + $0x70] ss:$8 sps:$4 sm:$0xff]   ;;  %v2847_v16 = vmov 0  }
 0x3ba   : > { %v1770_v21 = vmax.f32 %v1762_v5, %v1769_v20 }
 0x3bb   : > { %v2687_v22 = vpop.f32.mrb[64].mxu1 }
 0x3bc   : > { %v1716_v23 = vadd.f32 %v2687_v22, %v3264_v44  ;;  %v1707_v24 = vpop.f32.mrb[65].mxu1 }
 0x3bd   : > { %v1708_v25 = vadd.f32 %v3264_v44, %v1707_v24  ;;  %v2688_v51 = vpop.f32.mrb[66].mxu1 }
 0x3be   : > { %v1779_v27 = vsel %vm1232_vm4, %v1716_v23, -inf  ;;  %v1719_v28 = vadd.f32 %v2688_v51, %v3264_v44  ;;  %v1710_v29 = vpop.f32.mrb[67].mxu1 }
 0x3bf   : > { %v1780_v30 = vmax.f32 %v1772_v14, %v1779_v27  ;;  %v1775_v31 = vsel %vm1232_vm4, %v1708_v25, -inf  ;;  %v1711_v32 = vadd.f32 %v3264_v44, %v1710_v29  ;;  %v2818_v14 = vld [vmem:[%s3438_s13 + $0x74] ss:$8 sps:$4 sm:$0xff]  }
 0x3c0   : > { %v1776_v33 = vmax.f32 %v1768_v17, %v1775_v31  ;;  %v1781_v34 = vsel %vm1232_vm4, %v1719_v28, -inf  ;;  %v2083_v28 = vlaneseq  ;;  %v2001_v31 = vld [vmem:[%s3439_s14] sm:$0x3] }
 0x3c1   : > { %v1782_v35 = vmax.f32 %v1774_v19, %v1781_v34  ;;  %v1777_v36 = vsel %vm1232_vm4, %v1711_v32, -inf }
 0x3c2   : > { %v1778_v38 = vmax.f32 %v1770_v21, %v1777_v36  ;;  %v2084_v29 = vshrl.u32 %v2083_v28, 7  ;;  %vm2154_vm7 = vcmp.lt.s32.totalorder %v2083_v28, 192 }
 0x3c3   : > { %v1784_v39 = vmax.f32 %v1780_v30, %v1782_v35 }
 0x3c4   : > { %v1783_v41 = vmax.f32 %v1776_v33, %v1778_v38  ;;  %v2085_v30 = vsub.s32 0, %v2084_v29  ;;  %v2089_v32 = vsub.s32 1, %v2084_v29  ;;  %v2848_v33 = vmov 1966171168  }
 0x3c5   : > { %v2138_v34 = vunpack.c.l.s4 %v2848_v33 }
 0x3c6   : > { %v1785_v42 = vmax.f32 %v1783_v41, %v1784_v39  ;;  %v2086_v35 = vrot.slane %v2001_v31, %v2085_v30  ;;  %v2090_v36 = vrot.slane %v2001_v31, %v2089_v32 }
 0x3c7   : > { %v2139_v38 = vunpack.c.0.s8 %v2138_v34 }
 0x3c8   : > { %v1786_v43 = vrot.slane %v1785_v42, 4 }
 0x3ca   : > { %v1787_v45 = vmax.f32 %v1785_v42, %v1786_v43 }
 0x3cc   : > { %v1788_v46 = vrot.slane %v1787_v45, 2 }
 0x3ce   : > { %v1789_v59 = vmax.f32 %v1787_v45, %v1788_v46  ;;  %v2142_v45 = vsub.s32 %v2139_v38, %v2084_v29 }
 0x3d0   : > { %v1790_v47 = vrot.slane %v1789_v59, 1 }
 0x3d2   : > { %v1791_v37 = vmax.f32 %v1789_v59, %v1790_v47 }
 0x3d4   : > { %v1792_v40 = vmax.f32 %v1722_v48, %v1791_v37 }
 0x3d6   : > { %1794 = vst.msk [vmem:[#allocation2] sm:$0x1] %vm589_vm5, %v1792_v40 }
 0x3dd   : > { %v1798_v44 = vld [vmem:[#allocation2] sm:$0x1] }
 0x3de   : > { %v1799_v49 = vpack.c.bf16 %v1798_v44, %v1798_v44 }
 0x3e0   : > { %2698 = vmatmul.mubr.msk.bf16.vlgmr.msra.gmra.mrb[60].mxu0 %vm1232_vm4, %v1799_v49 }
 0x3e1   : > { %2094 = vmatpush1.bf16.msra.mxu0 %v2795_v50  ;;  %2125 = vmatprep.mubr.bf16.mxu0 %v2847_v16 }
 0x3e2   : > { %2095 = vmatprep.subr.bf16.mxu0 %v2800_v53 }
 0x3e5   : > { %2096 = vmatpush1.bf16.msra.mxu0 %v2798_v54 }
 0x3e6   : > { %2097 = vmatprep.subr.bf16.mxu0 %v2803_v55 }
 0x3e9   : > { %2098 = vmatpush1.bf16.msra.mxu0 %v2801_v56 }
 0x3ea   : > { %2099 = vmatprep.subr.bf16.mxu0 %v2806_v57 }
 0x3ed   : > { %2100 = vmatpush1.bf16.msra.mxu0 %v2804_v58 }
 0x3ee   : > { %2101 = vmatprep.subr.bf16.mxu0 %v2809_v60 }
 0x3f1   : > { %2102 = vmatpush1.bf16.msra.mxu0 %v2807_v61 }
 0x3f2   : > { %2103 = vmatprep.subr.bf16.mxu0 %v2812_v62 }
 0x3f5   : > { %2104 = vmatpush1.bf16.msra.mxu0 %v2810_v63 }
 0x3f6   : > { %2105 = vmatprep.subr.bf16.mxu0 %v2815_v0 }
 0x3f9   : > { %2106 = vmatpush1.bf16.msra.mxu0 %v2813_v1 }
 0x3fa   : > { %2107 = vmatprep.subr.bf16.mxu0 %v2818_v14 }
 0x3fd   : > { %2108 = vmatpush1.bf16.msra.mxu0 %v2816_v15 }
 0x4b3   : > { %v1870_v3 = vpop.f32.mrb[60].mxu0 }
 0x4b4   : > { %v1871_v4 = vadd.f32 %v1870_v3, %v1808_v2  ;;  %v2699_v5 = vpop.f32.mrb[61].mxu0 }
 0x4b5   : > { %v1873_v6 = vpop.f32.mrb[62].mxu0 }
 0x4b6   : > { %v1876_v7 = vmax.f32 %v1871_v4, 0.0  ;;  %v2700_v8 = vpop.f32.mrb[63].mxu0 }
 0x4b8   : > { %v1877_v10 = vpack.c.bf16 %v1876_v7, %v1876_v7 }
 0x4ba   : > { %2718 = vmatmul.mubr.bf16.vlgmr.msra.gmra.mrb[68].mxu1 %v1877_v10 }
 0x4bb   : > { %2722 = vmatpush3.bf16.msra.mxu1 %v2791_v9  ;;  %2729 = vmatprep.mubr.msk.bf16.mxu1 %vm2846_vm6, %v2844_v26 }
 0x4bc   : > { %2723 = vmatprep.subr.bf16.mxu1 %v2844_v26 }
 0x4bf   : > { %2724 = vmatpush3.bf16.msra.mxu1 %v2792_v11 }
 0x4c0   : > { %2725 = vmatprep.subr.bf16.mxu1 %v2844_v26 }
 0x4c3   : > { %2726 = vmatpush3.bf16.msra.mxu1 %v2793_v12 }
 0x4c4   : > { %2727 = vmatprep.subr.bf16.mxu1 %v2844_v26  ;;  %v1894_v26 = vld [vmem:[%s3437_s12] sm:$0x1] }
 0x4c7   : > { %2728 = vmatpush3.bf16.msra.mxu1 %v2794_v13 }
 0x4ca   : > { %2730 = vmatmul.mubr.msk.bf16.vlgmr.msra.gmra.mrb[72].mxu1 %vm1232_vm4, %v1799_v49 }
 0x58d   : > { %v1977_v17 = vpop.f32.mrb[68].mxu1 }
 0x58e   : > { %v1978_v18 = vadd.f32 %v1977_v17, %v1894_v26  ;;  %v2719_v19 = vpop.f32.mrb[69].mxu1 }
 0x58f   : > { %v1980_v20 = vpop.f32.mrb[70].mxu1 }
 0x590   : > { %v1983_v21 = vmax.f32 %v1978_v18, 0.0  ;;  %v2720_v22 = vpop.f32.mrb[71].mxu1 }
 0x592   : > { %v1984_v23 = vpack.c.bf16 %v1983_v21, %v1983_v21 }
 0x594   : > { %2126 = vmatmul.mubr.bf16.vlgmr.msra.gmra.mrb[64].mxu0 %v1984_v23 }
 0x59d   : > { %v2223_v24 = vpop.f32.mrb[72].mxu1 }
 0x59e   : > { %2229 = vst.msk [vmem:[%s583_s18] sm:$0x1] %vm589_vm5, %v2223_v24  ;;  %v2731_v25 = vpop.f32.mrb[73].mxu1 }
 0x59f   : > { %v2226_v51 = vpop.f32.mrb[74].mxu1 }
 0x5a0   : > { %v2732_v27 = vpop.f32.mrb[75].mxu1 }
 0x667   : > { %v2127_v39 = vpop.f32.mrb[64].mxu0 }
 0x668   : > { %v2128_v41 = vadd.f32 %v2127_v39, %v2086_v35  ;;  %v2129_v42 = vpop.f32.mrb[65].mxu0 }
 0x669   : > { %v2130_v43 = vadd.f32 %v2129_v42, %v2090_v36  ;;  %v2131_v46 = vpop.f32.mrb[66].mxu0 }
 0x66a   : > { %v2132_v59 = vpop.f32.mrb[67].mxu0 }
 0x66b   : > { %v2136_v47 = vcombine.low %v2128_v41, %v2130_v43 }
 0x66d   : > { %v2143_v48 = vrot.slane %v2136_v47, %v2142_v45 }
 0x66f   : > { %v2150_v37 = vrot.slane %v2143_v48, %v2142_v45 }
 0x671   : > { %2156 = vst.msk [vmem:[%s580_s23] sm:$0x3] %vm2154_vm7, %v2150_v37 }
 0x672 PF: > { %s28_s26 = sadd.s32 1, %s2841_s26   ;;  %s3447_s24 = smov %s2837_s25 }
 0x673   : > { %p25_p5 = scmp.ge.s32.totalorder %s28_s26, 4   ;;  %s3448_s25 = smov %s3450_s27 }
 0x675   :  { %27 = sbr.rel (!%p25_p5) target bundleno = 3 (0x3), region = 134 }

</bundles_post_ra>
